<compile_context>
chip_gen: v7x
topology: tpu7x:2x2x1
jax: 0.10.0
libtpu: 0.0.40
codegen_flags: <defaults>
</compile_context>

<pallas_src>
import jax
import jax.numpy as jnp
from jax.experimental import pallas as pl
from jax.experimental.pallas import tpu as pltpu

EPS = 1e-5


def _vmem_limit_bytes():
    """Per-generation scoped-VMEM limit (~75% of physical VMEM)."""
    cap = 64 * 1024 * 1024  # safe fallback (v7x-sized)
    try:
        cap = int(getattr(pltpu.get_tpu_info(), "vmem_capacity_bytes", cap))
    except Exception:
        pass
    return (cap * 3) // 4


VMEM_LIMIT = _vmem_limit_bytes()


def _pick_row_tile(Hp, fixed_bytes, bytes_per_row, budget, cap=None):
    """Largest divisor of Hp whose per-grid-step VMEM footprint fits the budget."""
    hi = Hp if cap is None else max(1, min(Hp, cap))
    best = 1
    for t in range(1, hi + 1):
        if Hp % t == 0 and fixed_bytes + t * bytes_per_row <= budget:
            best = t
    return best


# ------------------------------------------------------------------------- #
# shared in-kernel helpers
# ------------------------------------------------------------------------- #
def _fill_padded(pad_ref, interior, top, bot, rows, Wp):
    """Write the zero-padded bf16 activation tile into the persistent scratch.

    Only the two 1-px border columns are zeroed; the halo rows (`top`/`bot`,
    already zeroed at image borders) and the interior overwrite the rest.
    """
    dt = pad_ref.dtype
    Cin = pad_ref.shape[-1]
    zcol = jnp.zeros((rows + 2, 1, Cin), dt)
    pad_ref[:, 0:1, :] = zcol
    pad_ref[:, Wp + 1:Wp + 2, :] = zcol
    pad_ref[0:1, 1:Wp + 1, :] = top.astype(dt)                    # (1, Wp, Cin)
    pad_ref[rows + 1:rows + 2, 1:Wp + 1, :] = bot.astype(dt)      # (1, Wp, Cin)
    pad_ref[1:rows + 1, 1:Wp + 1, :] = interior.astype(dt)        # (rows, Wp, Cin)


def _conv3x3_acc(pad_ref, w_ref, rows, Wp, Cout):
    """3x3 SAME conv of the padded bf16 tile: 3 accumulated dots with K=3*Cin.

    pad_ref: (rows+2, Wp+2, Cin) bf16.  w_ref: (3, 3*Cin, Cout) bf16, where
    w_ref[dx] rows are ordered (dy, cin) to match the dy-concatenated slab.
    Returns an f32 (rows*Wp, Cout) accumulator.
    """
    Cin = pad_ref.shape[-1]
    acc = jnp.zeros((rows * Wp, Cout), jnp.float32)
    for dx in range(3):
        slab = jnp.concatenate(
            [pad_ref[dy:dy + rows, dx:dx + Wp, :] for dy in range(3)],
            axis=-1).reshape(rows * Wp, 3 * Cin)
        acc = acc + jnp.dot(slab, w_ref[dx], preferred_element_type=jnp.float32)
    return acc


def _tile_bn_partials(acc):
    """Per-tile sum and *centered* sum-of-squares (numerically stable partials)."""
    cnt = acc.shape[0]
    s = jnp.sum(acc, axis=0)
    d = acc - s / cnt
    q = jnp.sum(d * d, axis=0)
    return s, q


# ------------------------------------------------------------------------- #
# K1: maxpool(2,2) + conv1 + BN1 partial stats
# ------------------------------------------------------------------------- #
def _pool_conv_stats_kernel(xm_ref, xt_ref, xb_ref, w_ref,
                            y_ref, s_ref, q_ref, pad_ref):
    # xm_ref: (1, Ht, 2, Wp, 2*Cin) f32    xt/xb_ref: (1, 1, 2, Wp, 2*Cin) f32
    # w_ref : (3, 3*Cin, C1) bf16
    # y_ref : (1, Ht, Wp, C1) bf16         s_ref/q_ref: (1, 1, 1, C1) f32
    # pad_ref: (Ht+2, Wp+2, Cin) bf16 scratch
    Ht, Wp, C1 = y_ref.shape[1], y_ref.shape[2], y_ref.shape[3]
    Cin = pad_ref.shape[-1]
    r = pl.program_id(1)
    last = pl.num_programs(1) - 1

    def pool(v):  # (rows, 2, Wp, 2*Cin) -> (rows, Wp, Cin) f32, 2x2 max
        v = v.astype(jnp.float32)
        m = jnp.maximum(v[:, 0], v[:, 1])                 # row pair
        return jnp.maximum(m[..., :Cin], m[..., Cin:])    # column pair

    interior = pool(xm_ref[0])                            # (Ht, Wp, Cin)
    top = jnp.where(r > 0, pool(xt_ref[0]), 0.0)          # (1, Wp, Cin)
    bot = jnp.where(r < last, pool(xb_ref[0]), 0.0)       # (1, Wp, Cin)

    _fill_padded(pad_ref, interior, top, bot, Ht, Wp)
    acc = _conv3x3_acc(pad_ref, w_ref, Ht, Wp, C1)        # (Ht*Wp, C1) f32

    s, q = _tile_bn_partials(acc)
    s_ref[...] = s.reshape(1, 1, 1, C1)
    q_ref[...] = q.reshape(1, 1, 1, C1)
    y_ref[0] = acc.reshape(Ht, Wp, C1).astype(y_ref.dtype)


def pool_conv_stats(x, w_stack, Ht):
    """x: (N, H, W, Cin) NHWC f32, even H/W.  w_stack: (3, 3*Cin, C1) bf16."""
    N, H, W, Cin = x.shape
    Hp, Wp = H // 2, W // 2
    C1 = w_stack.shape[-1]
    R = Hp // Ht
    # free row-major reshape: trailing block dims stay dense as (Wp, 2*Cin)
    xr = x.reshape(N, Hp, 2, Wp, 2 * Cin)

    flops = 2 * N * Hp * Wp * 9 * Cin * C1 + 3 * N * H * W * Cin
    bytes_accessed = (4 * x.size + 2 * w_stack.size
                      + 2 * N * Hp * Wp * C1 + 8 * N * R * C1)

    return pl.pallas_call(
        _pool_conv_stats_kernel,
        out_shape=(jax.ShapeDtypeStruct((N, Hp, Wp, C1), jnp.bfloat16),
                   jax.ShapeDtypeStruct((N, R, 1, C1), jnp.float32),
                   jax.ShapeDtypeStruct((N, R, 1, C1), jnp.float32)),
        grid=(N, R),
        in_specs=[
            pl.BlockSpec((1, Ht, 2, Wp, 2 * Cin), lambda n, r: (n, r, 0, 0, 0)),
            # top / bottom halo pooled rows (index clamped at image borders;
            # the kernel zeroes them there via jnp.where)
            pl.BlockSpec((1, 1, 2, Wp, 2 * Cin),
                         lambda n, r: (n, jnp.maximum(r * Ht - 1, 0), 0, 0, 0)),
            pl.BlockSpec((1, 1, 2, Wp, 2 * Cin),
                         lambda n, r: (n, jnp.minimum(r * Ht + Ht, Hp - 1), 0, 0, 0)),
            # TODO(synk): pipeline_mode=pl.Buffered(1) here would single-buffer
            # the constant-index weight block and save one weight copy of VMEM.
            pl.BlockSpec((3, 3 * Cin, C1), lambda n, r: (0, 0, 0)),
        ],
        out_specs=(
            pl.BlockSpec((1, Ht, Wp, C1), lambda n, r: (n, r, 0, 0)),
            pl.BlockSpec((1, 1, 1, C1), lambda n, r: (n, r, 0, 0)),
            pl.BlockSpec((1, 1, 1, C1), lambda n, r: (n, r, 0, 0)),
        ),
        scratch_shapes=[pltpu.VMEM((Ht + 2, Wp + 2, Cin), jnp.bfloat16)],
        compiler_params=pltpu.CompilerParams(
            dimension_semantics=("parallel", "parallel"),
            vmem_limit_bytes=VMEM_LIMIT),
        cost_estimate=pl.CostEstimate(flops=flops, transcendentals=0,
                                      bytes_accessed=bytes_accessed),
    )(xr, xr, xr, w_stack)


# ------------------------------------------------------------------------- #
# K2: BN1 affine + ReLU (fused on load) + conv2 + BN2 partial stats
# ------------------------------------------------------------------------- #
def _bnrelu_conv_stats_kernel(ym_ref, yt_ref, yb_ref, sc_ref, sh_ref, w_ref,
                              o_ref, s_ref, q_ref, pad_ref):
    # ym_ref: (1, Ht, Wp, C1) bf16   yt/yb_ref: (1, 1, Wp, C1) bf16
    # sc/sh : (1, C1) f32            w_ref: (3, 3*C1, C2) bf16
    # o_ref : (1, Ht, Wp, C2) bf16   s_ref/q_ref: (1, 1, 1, C2) f32
    Ht, Wp, C2 = o_ref.shape[1], o_ref.shape[2], o_ref.shape[3]
    r = pl.program_id(1)
    last = pl.num_programs(1) - 1
    sc = sc_ref[0]
    sh = sh_ref[0]

    def act(v):  # BN1 affine + ReLU, computed in f32 (v5e has no bf16 VPU)
        return jnp.maximum(v.astype(jnp.float32) * sc + sh, 0.0)

    interior = act(ym_ref[0])                             # (Ht, Wp, C1)
    top = jnp.where(r > 0, act(yt_ref[0]), 0.0)           # (1, Wp, C1)
    bot = jnp.where(r < last, act(yb_ref[0]), 0.0)        # (1, Wp, C1)

    _fill_padded(pad_ref, interior, top, bot, Ht, Wp)
    acc = _conv3x3_acc(pad_ref, w_ref, Ht, Wp, C2)        # (Ht*Wp, C2) f32

    s, q = _tile_bn_partials(acc)
    s_ref[...] = s.reshape(1, 1, 1, C2)
    q_ref[...] = q.reshape(1, 1, 1, C2)
    o_ref[0] = acc.reshape(Ht, Wp, C2).astype(o_ref.dtype)


def bnrelu_conv_stats(y, scale, shift, w_stack, Ht):
    N, Hp, Wp, C1 = y.shape
    C2 = w_stack.shape[-1]
    R = Hp // Ht
    flops = 2 * N * Hp * Wp * 9 * C1 * C2 + 5 * N * Hp * Wp * C1
    bytes_accessed = (2 * y.size + 2 * w_stack.size + 2 * N * Hp * Wp * C2
                      + 8 * N * R * C2 + 8 * C1)
    return pl.pallas_call(
        _bnrelu_conv_stats_kernel,
        out_shape=(jax.ShapeDtypeStruct((N, Hp, Wp, C2), jnp.bfloat16),
                   jax.ShapeDtypeStruct((N, R, 1, C2), jnp.float32),
                   jax.ShapeDtypeStruct((N, R, 1, C2), jnp.float32)),
        grid=(N, R),
        in_specs=[
            pl.BlockSpec((1, Ht, Wp, C1), lambda n, r: (n, r, 0, 0)),
            pl.BlockSpec((1, 1, Wp, C1),
                         lambda n, r: (n, jnp.maximum(r * Ht - 1, 0), 0, 0)),
            pl.BlockSpec((1, 1, Wp, C1),
                         lambda n, r: (n, jnp.minimum(r * Ht + Ht, Hp - 1), 0, 0)),
            pl.BlockSpec((1, C1), lambda n, r: (0, 0)),
            pl.BlockSpec((1, C1), lambda n, r: (0, 0)),
            pl.BlockSpec((3, 3 * C1, C2), lambda n, r: (0, 0, 0)),
        ],
        out_specs=(
            pl.BlockSpec((1, Ht, Wp, C2), lambda n, r: (n, r, 0, 0)),
            pl.BlockSpec((1, 1, 1, C2), lambda n, r: (n, r, 0, 0)),
            pl.BlockSpec((1, 1, 1, C2), lambda n, r: (n, r, 0, 0)),
        ),
        scratch_shapes=[pltpu.VMEM((Ht + 2, Wp + 2, C1), jnp.bfloat16)],
        compiler_params=pltpu.CompilerParams(
            dimension_semantics=("parallel", "parallel"),
            vmem_limit_bytes=VMEM_LIMIT),
        cost_estimate=pl.CostEstimate(flops=flops, transcendentals=0,
                                      bytes_accessed=bytes_accessed),
    )(y, y, y, scale, shift, w_stack)


# ------------------------------------------------------------------------- #
# K3: final BN2 affine + ReLU
# ------------------------------------------------------------------------- #
def _bn_relu_kernel(y_ref, sc_ref, sh_ref, o_ref):
    o_ref[0] = jnp.maximum(
        y_ref[0].astype(jnp.float32) * sc_ref[0] + sh_ref[0], 0.0
    ).astype(o_ref.dtype)


def bn_relu(y, scale, shift, Ht):
    N, Hp, Wp, C = y.shape
    R = Hp // Ht
    return pl.pallas_call(
        _bn_relu_kernel,
        out_shape=jax.ShapeDtypeStruct((N, Hp, Wp, C), jnp.float32),
        grid=(N, R),
        in_specs=[
            pl.BlockSpec((1, Ht, Wp, C), lambda n, r: (n, r, 0, 0)),
            pl.BlockSpec((1, C), lambda n, r: (0, 0)),
            pl.BlockSpec((1, C), lambda n, r: (0, 0)),
        ],
        out_specs=pl.BlockSpec((1, Ht, Wp, C), lambda n, r: (n, r, 0, 0)),
        compiler_params=pltpu.CompilerParams(
            dimension_semantics=("parallel", "parallel"),
            vmem_limit_bytes=VMEM_LIMIT),
        cost_estimate=pl.CostEstimate(
            flops=3 * N * Hp * Wp * C, transcendentals=0,
            bytes_accessed=2 * y.size + 4 * N * Hp * Wp * C + 8 * C),
    )(y, scale, shift)


# ------------------------------------------------------------------------- #
# wrapper glue
# ------------------------------------------------------------------------- #
def _bn_affine(ssum, ssq, count_per_tile, gamma, beta):
    """Combine per-tile (sum, centered sumsq) partials into BN scale/shift.

    Pooled-variance combination (numerically robust).  Matches PyTorch
    training-mode BatchNorm2d: batch stats over (N,H,W), biased variance.
    """
    c = float(count_per_tile)
    total = ssum.shape[0] * ssum.shape[1] * c
    mean = jnp.sum(ssum, axis=(0, 1, 2)) / total
    tile_mean = ssum / c
    m2 = (jnp.sum(ssq, axis=(0, 1, 2))
          + c * jnp.sum((tile_mean - mean) ** 2, axis=(0, 1, 2)))
    var = jnp.maximum(m2 / total, 0.0)
    scale = gamma * jax.lax.rsqrt(var + EPS)
    shift = beta - mean * scale
    return scale.reshape(1, -1), shift.reshape(1, -1)


def init_down_params(key, in_channels, out_channels):
    k1, k2 = jax.random.split(key, 2)
    # Conv biases omitted: training-mode (batch-stat) BN exactly cancels them.
    return {
        "w1": jax.random.normal(k1, (3, 3, in_channels, out_channels), jnp.float32) * 0.1,
        "w2": jax.random.normal(k2, (3, 3, out_channels, out_channels), jnp.float32) * 0.1,
        "gamma1": jnp.ones((out_channels,), jnp.float32),
        "beta1": jnp.zeros((out_channels,), jnp.float32),
        "gamma2": jnp.ones((out_channels,), jnp.float32),
        "beta2": jnp.zeros((out_channels,), jnp.float32),
    }


def down_forward(x_nchw, params, max_row_tile=None):
    """Equivalent of Down.forward. x_nchw: (N, Cin, H, W) -> (N, Cout, H/2, W/2)."""
    # TODO(synk): odd H/W would need MaxPool2d truncation; even sizes assumed.
    # TODO(synk): if the surrounding network stays NHWC, both transposes (and
    # K3, which could fuse into the next layer's kernel) can be dropped.
    # TODO(synk): for non-128-multiple channel counts, padding Cout/K to 128
    # would avoid masked partial stores on the lane dim.
    x = jnp.transpose(x_nchw, (0, 2, 3, 1)).astype(jnp.float32)   # NCHW -> NHWC
    N, H, W, Cin = x.shape
    Hp, Wp = H // 2, W // 2
    C1 = params["w1"].shape[-1]
    C2 = params["w2"].shape[-1]

    # Weights as bf16 (dx, 3*Cin, Cout) slabs, rows ordered (dy, cin), matching
    # the dy-concatenated im2col slabs inside the kernels.
    w1 = jnp.transpose(params["w1"], (1, 0, 2, 3)).reshape(3, 3 * Cin, C1).astype(jnp.bfloat16)
    w2 = jnp.transpose(params["w2"], (1, 0, 2, 3)).reshape(3, 3 * C1, C2).astype(jnp.bfloat16)

    # --- generation-aware spatial row tiling (per-step VMEM footprint) ------ #
    budget = VMEM_LIMIT // 2
    row1 = (2 * 2 * W * Cin * 4        # main input block (f32, double-buffered)
            + 2 * Wp * C1 * 2          # y1 output block (bf16, double-buffered)
            + (Wp + 2) * Cin * 2       # zero-padded activation scratch (bf16)
            + Wp * 3 * Cin * 2         # im2col slab transient (bf16)
            + Wp * C1 * 4              # f32 conv accumulator
            + 2 * W * Cin * 4)         # pooling transients
    fix1 = 2 * 3 * 3 * Cin * C1 * 2 + 8 * W * Cin * 4 + (1 << 20)
    Ht1 = _pick_row_tile(Hp, fix1, row1, budget, cap=max_row_tile)

    row2 = (2 * Wp * C1 * 2 + 2 * Wp * C2 * 2 + (Wp + 2) * C1 * 2
            + Wp * 3 * C1 * 2 + Wp * C2 * 4 + Wp * C1 * 4)
    fix2 = 2 * 3 * 3 * C1 * C2 * 2 + 4 * Wp * C1 * 2 + (1 << 20)
    Ht2 = _pick_row_tile(Hp, fix2, row2, budget, cap=max_row_tile)

    y1, s1, q1 = pool_conv_stats(x, w1, Ht1)                      # K1
    scale1, shift1 = _bn_affine(s1, q1, Ht1 * Wp, params["gamma1"], params["beta1"])

    y2, s2, q2 = bnrelu_conv_stats(y1, scale1, shift1, w2, Ht2)   # K2
    scale2, shift2 = _bn_affine(s2, q2, Ht2 * Wp, params["gamma2"], params["beta2"])

    out = bn_relu(y2, scale2, shift2, Ht2)                        # K3
    return jnp.transpose(out, (0, 3, 1, 2))                       # NHWC -> NCHW


# ------------------------------------------------------------------------- #
# pure-JAX reference (mirrors the kernel's precision policy: bf16 conv
# operands / bf16 inter-stage activations, f32 accumulation & BN math) so the
# comparison tolerance can stay tight.
# ------------------------------------------------------------------------- #
def _down_reference(x_nchw, params):
    x = jnp.transpose(x_nchw, (0, 2, 3, 1)).astype(jnp.float32)
    N, H, W, Cin = x.shape
    x = x.reshape(N, H // 2, 2, W // 2, 2, Cin).max(axis=(2, 4))

    def conv(x, w):
        return jax.lax.conv_general_dilated(
            x.astype(jnp.bfloat16), w.astype(jnp.bfloat16),
            window_strides=(1, 1), padding="SAME",
            dimension_numbers=("NHWC", "HWIO", "NHWC"),
            preferred_element_type=jnp.float32)

    def bn_relu_ref(y, gamma, beta):
        mean = jnp.mean(y, axis=(0, 1, 2))
        var = jnp.var(y, axis=(0, 1, 2))
        yq = y.astype(jnp.bfloat16).astype(jnp.float32)   # matches bf16 y1/y2 storage
        return jnp.maximum((yq - mean) * jax.lax.rsqrt(var + EPS) * gamma + beta, 0.0)

    y1 = conv(x, params["w1"])
    a1 = bn_relu_ref(y1, params["gamma1"], params["beta1"])
    y2 = conv(a1, params["w2"])
    out = bn_relu_ref(y2, params["gamma2"], params["beta2"])
    return jnp.transpose(out, (0, 3, 1, 2))


if __name__ == "__main__":
    key = jax.random.PRNGKey(0)
    kx, kp, kx2, kp2 = jax.random.split(key, 4)

    # Case 1: small shapes implied by the module (Down(4, 8), 2x4x16x16 input).
    N, Cin, H, W = 2, 4, 16, 16
    Cout = 8
    x = jax.random.normal(kx, (N, Cin, H, W), jnp.float32)
    params = init_down_params(kp, Cin, Cout)

    out = jax.block_until_ready(down_forward(x, params))
    assert out.shape == (N, Cout, H // 2, W // 2), out.shape
    ref = jax.block_until_ready(_down_reference(x, params))
    err = float(jnp.max(jnp.abs(out - ref)))
    assert jnp.allclose(out, ref, atol=1e-2, rtol=1e-2), err

    # Case 2: force several row tiles per image so the conv halo rows carry
    # real neighbour data (exercises the spatial-tiling path end to end).
    x2 = jax.random.normal(kx2, (1, 4, 32, 32), jnp.float32)
    params2 = init_down_params(kp2, 4, 8)
    out2 = jax.block_until_ready(down_forward(x2, params2, max_row_tile=4))
    ref2 = jax.block_until_ready(_down_reference(x2, params2))
    err2 = float(jnp.max(jnp.abs(out2 - ref2)))
    assert jnp.allclose(out2, ref2, atol=1e-2, rtol=1e-2), err2

    print("KERNEL_OK")
</pallas_src>

<mosaic_0001>
module attributes {stable_mosaic.version = 11 : i64} {
  func.func @_pool_conv_stats_kernel(%arg0: i32, %arg1: i32, %arg2: memref<1x8x2x8x8xf32, #tpu.memory_space<vmem>>, %arg3: memref<1x1x2x8x8xf32, #tpu.memory_space<vmem>>, %arg4: memref<1x1x2x8x8xf32, #tpu.memory_space<vmem>>, %arg5: memref<3x12x8xbf16, #tpu.memory_space<vmem>>, %arg6: memref<1x8x8x8xbf16, #tpu.memory_space<vmem>>, %arg7: memref<1x1x1x8xf32, #tpu.memory_space<vmem>>, %arg8: memref<1x1x1x8xf32, #tpu.memory_space<vmem>>, %arg9: memref<10x10x4xbf16, #tpu.memory_space<vmem>>) attributes {dimension_semantics = [#tpu.dimension_semantics<parallel>, #tpu.dimension_semantics<parallel>], iteration_bounds = array<i64: 2, 1>, scalar_prefetch = 0 : i64, scratch_operands = 1 : i64, tpu.core_type = #tpu.core_type<tc>, window_params = [{transform_indices = @transform_0, window_bounds = array<i64: 1, 8, 2, 8, 8>}, {transform_indices = @transform_1, window_bounds = array<i64: 1, 1, 2, 8, 8>}, {transform_indices = @transform_2, window_bounds = array<i64: 1, 1, 2, 8, 8>}, {pipeline_mode = #tpu.pipeline_mode<synchronous>, transform_indices = @transform_3, window_bounds = array<i64: 3, 12, 8>}, {transform_indices = @transform_4, window_bounds = array<i64: 1, 8, 8, 8>}, {transform_indices = @transform_5, window_bounds = array<i64: 1, 1, 1, 8>}, {transform_indices = @transform_6, window_bounds = array<i64: 1, 1, 1, 8>}]} {
    %c0 = arith.constant 0 : index
    %c0_0 = arith.constant 0 : index
    %c0_1 = arith.constant 0 : index
    %c0_2 = arith.constant 0 : index
    %c0_3 = arith.constant 0 : index
    %0 = vector.load %arg2[%c0, %c0_0, %c0_1, %c0_2, %c0_3] : memref<1x8x2x8x8xf32, #tpu.memory_space<vmem>>, vector<1x8x2x8x8xf32>
    %1 = vector.shape_cast %0 : vector<1x8x2x8x8xf32> to vector<8x2x8x8xf32>
    %2 = vector.extract_strided_slice %1 {offsets = [0, 0, 0, 0], sizes = [8, 1, 8, 8], strides = [1, 1, 1, 1]} : vector<8x2x8x8xf32> to vector<8x1x8x8xf32>
    %3 = vector.shape_cast %2 : vector<8x1x8x8xf32> to vector<8x8x8xf32>
    %4 = vector.extract_strided_slice %1 {offsets = [0, 1, 0, 0], sizes = [8, 1, 8, 8], strides = [1, 1, 1, 1]} : vector<8x2x8x8xf32> to vector<8x1x8x8xf32>
    %5 = vector.shape_cast %4 : vector<8x1x8x8xf32> to vector<8x8x8xf32>
    %6 = arith.maximumf %3, %5 : vector<8x8x8xf32>
    %7 = vector.extract_strided_slice %6 {offsets = [0, 0, 0], sizes = [8, 8, 4], strides = [1, 1, 1]} : vector<8x8x8xf32> to vector<8x8x4xf32>
    %8 = vector.extract_strided_slice %6 {offsets = [0, 0, 4], sizes = [8, 8, 4], strides = [1, 1, 1]} : vector<8x8x8xf32> to vector<8x8x4xf32>
    %9 = arith.maximumf %7, %8 : vector<8x8x4xf32>
    %c0_i32 = arith.constant 0 : i32
    %10 = arith.cmpi sgt, %arg1, %c0_i32 : i32
    %c0_4 = arith.constant 0 : index
    %c0_5 = arith.constant 0 : index
    %c0_6 = arith.constant 0 : index
    %c0_7 = arith.constant 0 : index
    %c0_8 = arith.constant 0 : index
    %11 = vector.load %arg3[%c0_4, %c0_5, %c0_6, %c0_7, %c0_8] : memref<1x1x2x8x8xf32, #tpu.memory_space<vmem>>, vector<1x1x2x8x8xf32>
    %12 = vector.shape_cast %11 : vector<1x1x2x8x8xf32> to vector<1x2x8x8xf32>
    %13 = vector.extract_strided_slice %12 {offsets = [0, 0, 0, 0], sizes = [1, 1, 8, 8], strides = [1, 1, 1, 1]} : vector<1x2x8x8xf32> to vector<1x1x8x8xf32>
    %14 = vector.shape_cast %13 : vector<1x1x8x8xf32> to vector<1x8x8xf32>
    %15 = vector.extract_strided_slice %12 {offsets = [0, 1, 0, 0], sizes = [1, 1, 8, 8], strides = [1, 1, 1, 1]} : vector<1x2x8x8xf32> to vector<1x1x8x8xf32>
    %16 = vector.shape_cast %15 : vector<1x1x8x8xf32> to vector<1x8x8xf32>
    %17 = arith.maximumf %14, %16 : vector<1x8x8xf32>
    %18 = vector.extract_strided_slice %17 {offsets = [0, 0, 0], sizes = [1, 8, 4], strides = [1, 1, 1]} : vector<1x8x8xf32> to vector<1x8x4xf32>
    %19 = vector.extract_strided_slice %17 {offsets = [0, 0, 4], sizes = [1, 8, 4], strides = [1, 1, 1]} : vector<1x8x8xf32> to vector<1x8x4xf32>
    %20 = arith.maximumf %18, %19 : vector<1x8x4xf32>
    %cst = arith.constant 0.000000e+00 : f32
    %21 = vector.broadcast %cst : f32 to vector<1x8x4xf32>
    %22 = arith.select %10, %20, %21 : vector<1x8x4xf32>
    %c0_i32_9 = arith.constant 0 : i32
    %23 = arith.cmpi slt, %arg1, %c0_i32_9 : i32
    %c0_10 = arith.constant 0 : index
    %c0_11 = arith.constant 0 : index
    %c0_12 = arith.constant 0 : index
    %c0_13 = arith.constant 0 : index
    %c0_14 = arith.constant 0 : index
    %24 = vector.load %arg4[%c0_10, %c0_11, %c0_12, %c0_13, %c0_14] : memref<1x1x2x8x8xf32, #tpu.memory_space<vmem>>, vector<1x1x2x8x8xf32>
    %25 = vector.shape_cast %24 : vector<1x1x2x8x8xf32> to vector<1x2x8x8xf32>
    %26 = vector.extract_strided_slice %25 {offsets = [0, 0, 0, 0], sizes = [1, 1, 8, 8], strides = [1, 1, 1, 1]} : vector<1x2x8x8xf32> to vector<1x1x8x8xf32>
    %27 = vector.shape_cast %26 : vector<1x1x8x8xf32> to vector<1x8x8xf32>
    %28 = vector.extract_strided_slice %25 {offsets = [0, 1, 0, 0], sizes = [1, 1, 8, 8], strides = [1, 1, 1, 1]} : vector<1x2x8x8xf32> to vector<1x1x8x8xf32>
    %29 = vector.shape_cast %28 : vector<1x1x8x8xf32> to vector<1x8x8xf32>
    %30 = arith.maximumf %27, %29 : vector<1x8x8xf32>
    %31 = vector.extract_strided_slice %30 {offsets = [0, 0, 0], sizes = [1, 8, 4], strides = [1, 1, 1]} : vector<1x8x8xf32> to vector<1x8x4xf32>
    %32 = vector.extract_strided_slice %30 {offsets = [0, 0, 4], sizes = [1, 8, 4], strides = [1, 1, 1]} : vector<1x8x8xf32> to vector<1x8x4xf32>
    %33 = arith.maximumf %31, %32 : vector<1x8x4xf32>
    %cst_15 = arith.constant 0.000000e+00 : f32
    %34 = vector.broadcast %cst_15 : f32 to vector<1x8x4xf32>
    %35 = arith.select %23, %33, %34 : vector<1x8x4xf32>
    %cst_16 = arith.constant 0.000000e+00 : bf16
    %36 = vector.broadcast %cst_16 : bf16 to vector<10x1x4xbf16>
    %c0_17 = arith.constant 0 : index
    %c0_18 = arith.constant 0 : index
    %c0_19 = arith.constant 0 : index
    %37 = vector.load %arg9[%c0_17, %c0_18, %c0_19] : memref<10x10x4xbf16, #tpu.memory_space<vmem>>, vector<10x1x4xbf16>
    tpu.vector_store %arg9[%c0_17, %c0_18, %c0_19], %36 {strides = array<i32>} : memref<10x10x4xbf16, #tpu.memory_space<vmem>>, vector<10x1x4xbf16>,
    %c0_20 = arith.constant 0 : index
    %c9 = arith.constant 9 : index
    %c0_21 = arith.constant 0 : index
    %38 = vector.load %arg9[%c0_20, %c9, %c0_21] : memref<10x10x4xbf16, #tpu.memory_space<vmem>>, vector<10x1x4xbf16>
    tpu.vector_store %arg9[%c0_20, %c9, %c0_21], %36 {strides = array<i32>} : memref<10x10x4xbf16, #tpu.memory_space<vmem>>, vector<10x1x4xbf16>,
    %39 = arith.truncf %22 : vector<1x8x4xf32> to vector<1x8x4xbf16>
    %c0_22 = arith.constant 0 : index
    %c1 = arith.constant 1 : index
    %c0_23 = arith.constant 0 : index
    %40 = vector.load %arg9[%c0_22, %c1, %c0_23] : memref<10x10x4xbf16, #tpu.memory_space<vmem>>, vector<1x8x4xbf16>
    tpu.vector_store %arg9[%c0_22, %c1, %c0_23], %39 {strides = array<i32>} : memref<10x10x4xbf16, #tpu.memory_space<vmem>>, vector<1x8x4xbf16>,
    %41 = arith.truncf %35 : vector<1x8x4xf32> to vector<1x8x4xbf16>
    %c9_24 = arith.constant 9 : index
    %c1_25 = arith.constant 1 : index
    %c0_26 = arith.constant 0 : index
    %42 = vector.load %arg9[%c9_24, %c1_25, %c0_26] : memref<10x10x4xbf16, #tpu.memory_space<vmem>>, vector<1x8x4xbf16>
    tpu.vector_store %arg9[%c9_24, %c1_25, %c0_26], %41 {strides = array<i32>} : memref<10x10x4xbf16, #tpu.memory_space<vmem>>, vector<1x8x4xbf16>,
    %43 = arith.truncf %9 : vector<8x8x4xf32> to vector<8x8x4xbf16>
    %c1_27 = arith.constant 1 : index
    %c1_28 = arith.constant 1 : index
    %c0_29 = arith.constant 0 : index
    %44 = vector.load %arg9[%c1_27, %c1_28, %c0_29] : memref<10x10x4xbf16, #tpu.memory_space<vmem>>, vector<8x8x4xbf16>
    tpu.vector_store %arg9[%c1_27, %c1_28, %c0_29], %43 {strides = array<i32>} : memref<10x10x4xbf16, #tpu.memory_space<vmem>>, vector<8x8x4xbf16>,
    %cst_30 = arith.constant 0.000000e+00 : f32
    %45 = vector.broadcast %cst_30 : f32 to vector<64x8xf32>
    %c0_31 = arith.constant 0 : index
    %c0_32 = arith.constant 0 : index
    %c0_33 = arith.constant 0 : index
    %46 = vector.load %arg9[%c0_31, %c0_32, %c0_33] : memref<10x10x4xbf16, #tpu.memory_space<vmem>>, vector<8x8x4xbf16>
    %c1_34 = arith.constant 1 : index
    %c0_35 = arith.constant 0 : index
    %c0_36 = arith.constant 0 : index
    %47 = vector.load %arg9[%c1_34, %c0_35, %c0_36] : memref<10x10x4xbf16, #tpu.memory_space<vmem>>, vector<8x8x4xbf16>
    %c2 = arith.constant 2 : index
    %c0_37 = arith.constant 0 : index
    %c0_38 = arith.constant 0 : index
    %48 = vector.load %arg9[%c2, %c0_37, %c0_38] : memref<10x10x4xbf16, #tpu.memory_space<vmem>>, vector<8x8x4xbf16>
    %49 = tpu.concatenate %46, %47, %48 in 2 : vector<8x8x4xbf16>, vector<8x8x4xbf16>, vector<8x8x4xbf16> -> vector<8x8x12xbf16>
    %50 = vector.shape_cast %49 : vector<8x8x12xbf16> to vector<64x12xbf16>
    %c0_39 = arith.constant 0 : index
    %c0_40 = arith.constant 0 : index
    %c0_41 = arith.constant 0 : index
    %51 = vector.load %arg5[%c0_39, %c0_40, %c0_41] : memref<3x12x8xbf16, #tpu.memory_space<vmem>>, vector<1x12x8xbf16>
    %52 = vector.shape_cast %51 : vector<1x12x8xbf16> to vector<12x8xbf16>
    %cst_42 = arith.constant dense<0.000000e+00> : vector<64x8xf32>
    %53 = tpu.matmul %50, %52, %cst_42 {dimension_numbers = #tpu.dot_dimension_numbers<[1], [0], [0], [1], [0, 0, 1, 1], [], []>} : vector<64x12xbf16>, vector<12x8xbf16>, vector<64x8xf32> -> vector<64x8xf32>
    %54 = arith.addf %45, %53 : vector<64x8xf32>
    %c0_43 = arith.constant 0 : index
    %c1_44 = arith.constant 1 : index
    %c0_45 = arith.constant 0 : index
    %55 = vector.load %arg9[%c0_43, %c1_44, %c0_45] : memref<10x10x4xbf16, #tpu.memory_space<vmem>>, vector<8x8x4xbf16>
    %c1_46 = arith.constant 1 : index
    %c1_47 = arith.constant 1 : index
    %c0_48 = arith.constant 0 : index
    %56 = vector.load %arg9[%c1_46, %c1_47, %c0_48] : memref<10x10x4xbf16, #tpu.memory_space<vmem>>, vector<8x8x4xbf16>
    %c2_49 = arith.constant 2 : index
    %c1_50 = arith.constant 1 : index
    %c0_51 = arith.constant 0 : index
    %57 = vector.load %arg9[%c2_49, %c1_50, %c0_51] : memref<10x10x4xbf16, #tpu.memory_space<vmem>>, vector<8x8x4xbf16>
    %58 = tpu.concatenate %55, %56, %57 in 2 : vector<8x8x4xbf16>, vector<8x8x4xbf16>, vector<8x8x4xbf16> -> vector<8x8x12xbf16>
    %59 = vector.shape_cast %58 : vector<8x8x12xbf16> to vector<64x12xbf16>
    %c1_52 = arith.constant 1 : index
    %c0_53 = arith.constant 0 : index
    %c0_54 = arith.constant 0 : index
    %60 = vector.load %arg5[%c1_52, %c0_53, %c0_54] : memref<3x12x8xbf16, #tpu.memory_space<vmem>>, vector<1x12x8xbf16>
    %61 = vector.shape_cast %60 : vector<1x12x8xbf16> to vector<12x8xbf16>
    %cst_55 = arith.constant dense<0.000000e+00> : vector<64x8xf32>
    %62 = tpu.matmul %59, %61, %cst_55 {dimension_numbers = #tpu.dot_dimension_numbers<[1], [0], [0], [1], [0, 0, 1, 1], [], []>} : vector<64x12xbf16>, vector<12x8xbf16>, vector<64x8xf32> -> vector<64x8xf32>
    %63 = arith.addf %54, %62 : vector<64x8xf32>
    %c0_56 = arith.constant 0 : index
    %c2_57 = arith.constant 2 : index
    %c0_58 = arith.constant 0 : index
    %64 = vector.load %arg9[%c0_56, %c2_57, %c0_58] : memref<10x10x4xbf16, #tpu.memory_space<vmem>>, vector<8x8x4xbf16>
    %c1_59 = arith.constant 1 : index
    %c2_60 = arith.constant 2 : index
    %c0_61 = arith.constant 0 : index
    %65 = vector.load %arg9[%c1_59, %c2_60, %c0_61] : memref<10x10x4xbf16, #tpu.memory_space<vmem>>, vector<8x8x4xbf16>
    %c2_62 = arith.constant 2 : index
    %c2_63 = arith.constant 2 : index
    %c0_64 = arith.constant 0 : index
    %66 = vector.load %arg9[%c2_62, %c2_63, %c0_64] : memref<10x10x4xbf16, #tpu.memory_space<vmem>>, vector<8x8x4xbf16>
    %67 = tpu.concatenate %64, %65, %66 in 2 : vector<8x8x4xbf16>, vector<8x8x4xbf16>, vector<8x8x4xbf16> -> vector<8x8x12xbf16>
    %68 = vector.shape_cast %67 : vector<8x8x12xbf16> to vector<64x12xbf16>
    %c2_65 = arith.constant 2 : index
    %c0_66 = arith.constant 0 : index
    %c0_67 = arith.constant 0 : index
    %69 = vector.load %arg5[%c2_65, %c0_66, %c0_67] : memref<3x12x8xbf16, #tpu.memory_space<vmem>>, vector<1x12x8xbf16>
    %70 = vector.shape_cast %69 : vector<1x12x8xbf16> to vector<12x8xbf16>
    %cst_68 = arith.constant dense<0.000000e+00> : vector<64x8xf32>
    %71 = tpu.matmul %68, %70, %cst_68 {dimension_numbers = #tpu.dot_dimension_numbers<[1], [0], [0], [1], [0, 0, 1, 1], [], []>} : vector<64x12xbf16>, vector<12x8xbf16>, vector<64x8xf32> -> vector<64x8xf32>
    %72 = arith.addf %63, %71 : vector<64x8xf32>
    %cst_69 = arith.constant dense<0.000000e+00> : vector<8xf32>
    %73 = vector.multi_reduction <add>, %72, %cst_69 [0] : vector<64x8xf32> to vector<8xf32>
    %cst_70 = arith.constant 6.400000e+01 : f32
    %74 = vector.broadcast %cst_70 : f32 to vector<8xf32>
    %75 = arith.divf %73, %74 : vector<8xf32>
    %76 = vector.shape_cast %75 : vector<8xf32> to vector<1x8xf32>
    %77 = vector.broadcast %76 : vector<1x8xf32> to vector<64x8xf32>
    %78 = arith.subf %72, %77 : vector<64x8xf32>
    %79 = arith.mulf %78, %78 : vector<64x8xf32>
    %cst_71 = arith.constant dense<0.000000e+00> : vector<8xf32>
    %80 = vector.multi_reduction <add>, %79, %cst_71 [0] : vector<64x8xf32> to vector<8xf32>
    %81 = vector.shape_cast %73 : vector<8xf32> to vector<1x1x1x8xf32>
    %c0_72 = arith.constant 0 : index
    %c0_73 = arith.constant 0 : index
    %c0_74 = arith.constant 0 : index
    %c0_75 = arith.constant 0 : index
    %82 = vector.load %arg7[%c0_72, %c0_73, %c0_74, %c0_75] : memref<1x1x1x8xf32, #tpu.memory_space<vmem>>, vector<1x1x1x8xf32>
    tpu.vector_store %arg7[%c0_72, %c0_73, %c0_74, %c0_75], %81 {strides = array<i32>} : memref<1x1x1x8xf32, #tpu.memory_space<vmem>>, vector<1x1x1x8xf32>,
    %83 = vector.shape_cast %80 : vector<8xf32> to vector<1x1x1x8xf32>
    %c0_76 = arith.constant 0 : index
    %c0_77 = arith.constant 0 : index
    %c0_78 = arith.constant 0 : index
    %c0_79 = arith.constant 0 : index
    %84 = vector.load %arg8[%c0_76, %c0_77, %c0_78, %c0_79] : memref<1x1x1x8xf32, #tpu.memory_space<vmem>>, vector<1x1x1x8xf32>
    tpu.vector_store %arg8[%c0_76, %c0_77, %c0_78, %c0_79], %83 {strides = array<i32>} : memref<1x1x1x8xf32, #tpu.memory_space<vmem>>, vector<1x1x1x8xf32>,
    %85 = vector.shape_cast %72 : vector<64x8xf32> to vector<8x8x8xf32>
    %86 = arith.truncf %85 : vector<8x8x8xf32> to vector<8x8x8xbf16>
    %c0_80 = arith.constant 0 : index
    %c0_81 = arith.constant 0 : index
    %c0_82 = arith.constant 0 : index
    %c0_83 = arith.constant 0 : index
    %87 = vector.load %arg6[%c0_80, %c0_81, %c0_82, %c0_83] : memref<1x8x8x8xbf16, #tpu.memory_space<vmem>>, vector<1x8x8x8xbf16>
    %88 = vector.shape_cast %87 : vector<1x8x8x8xbf16> to vector<8x8x8xbf16>
    %89 = vector.shape_cast %86 : vector<8x8x8xbf16> to vector<1x8x8x8xbf16>
    tpu.vector_store %arg6[%c0_80, %c0_81, %c0_82, %c0_83], %89 {strides = array<i32>} : memref<1x8x8x8xbf16, #tpu.memory_space<vmem>>, vector<1x8x8x8xbf16>,
    return
  }
  func.func @transform_0(%arg0: i32, %arg1: i32) -> (i32, i32, i32, i32, i32) {
    %c0_i32 = arith.constant 0 : i32
    %c0_i32_0 = arith.constant 0 : i32
    %c0_i32_1 = arith.constant 0 : i32
    %c0_i32_2 = arith.constant 0 : i32
    return %arg0, %arg1, %c0_i32, %c0_i32_0, %c0_i32_1 : i32, i32, i32, i32, i32
  }
  func.func @transform_1(%arg0: i32, %arg1: i32) -> (i32, i32, i32, i32, i32) {
    %c8_i32 = arith.constant 8 : i32
    %0 = arith.muli %arg1, %c8_i32 : i32
    %c1_i32 = arith.constant 1 : i32
    %1 = arith.subi %0, %c1_i32 : i32
    %c0_i32 = arith.constant 0 : i32
    %2 = arith.maxsi %1, %c0_i32 : i32
    %c0_i32_0 = arith.constant 0 : i32
    %c0_i32_1 = arith.constant 0 : i32
    %c0_i32_2 = arith.constant 0 : i32
    %c0_i32_3 = arith.constant 0 : i32
    return %arg0, %2, %c0_i32_0, %c0_i32_1, %c0_i32_2 : i32, i32, i32, i32, i32
  }
  func.func @transform_2(%arg0: i32, %arg1: i32) -> (i32, i32, i32, i32, i32) {
    %c8_i32 = arith.constant 8 : i32
    %0 = arith.muli %arg1, %c8_i32 : i32
    %c8_i32_0 = arith.constant 8 : i32
    %1 = arith.addi %0, %c8_i32_0 : i32
    %c7_i32 = arith.constant 7 : i32
    %2 = arith.minsi %1, %c7_i32 : i32
    %c0_i32 = arith.constant 0 : i32
    %c0_i32_1 = arith.constant 0 : i32
    %c0_i32_2 = arith.constant 0 : i32
    %c0_i32_3 = arith.constant 0 : i32
    return %arg0, %2, %c0_i32, %c0_i32_1, %c0_i32_2 : i32, i32, i32, i32, i32
  }
  func.func @transform_3(%arg0: i32, %arg1: i32) -> (i32, i32, i32) {
    %c0_i32 = arith.constant 0 : i32
    %c0_i32_0 = arith.constant 0 : i32
    %c0_i32_1 = arith.constant 0 : i32
    %c0_i32_2 = arith.constant 0 : i32
    return %c0_i32, %c0_i32_0, %c0_i32_1 : i32, i32, i32
  }
  func.func @transform_4(%arg0: i32, %arg1: i32) -> (i32, i32, i32, i32) {
    %c0_i32 = arith.constant 0 : i32
    %c0_i32_0 = arith.constant 0 : i32
    %c0_i32_1 = arith.constant 0 : i32
    return %arg0, %arg1, %c0_i32, %c0_i32_0 : i32, i32, i32, i32
  }
  func.func @transform_5(%arg0: i32, %arg1: i32) -> (i32, i32, i32, i32) {
    %c0_i32 = arith.constant 0 : i32
    %c0_i32_0 = arith.constant 0 : i32
    %c0_i32_1 = arith.constant 0 : i32
    return %arg0, %arg1, %c0_i32, %c0_i32_0 : i32, i32, i32, i32
  }
  func.func @transform_6(%arg0: i32, %arg1: i32) -> (i32, i32, i32, i32) {
    %c0_i32 = arith.constant 0 : i32
    %c0_i32_0 = arith.constant 0 : i32
    %c0_i32_1 = arith.constant 0 : i32
    return %arg0, %arg1, %c0_i32, %c0_i32_0 : i32, i32, i32, i32
  }
}

</mosaic_0001>

<bundles_post_ra>
// kernel: tpu_custom_call.1
= control target key start
LH: loop header
LB: loop body
LE: loop exit
PB: predicated region body
PF: predicated region fallthrough
CT: control target
= control target key end

     0   :  { %s3846_s0 = inlined_call_operand.hbm [shape: f32[2,8,2,8,8], index: 0, kind: input, shape index: {}]   ;;  %s3847_s1 = inlined_call_operand.hbm [shape: f32[2,8,2,8,8], index: 1, kind: input, shape index: {}]   ;;  %s3848_s2 = inlined_call_operand.hbm [shape: f32[2,8,2,8,8], index: 2, kind: input, shape index: {}]   ;;  %s3849_s3 = inlined_call_operand.vmem [shape: bf16[3,12,8], index: 3, kind: input, shape index: {}]   ;;  %s3850_s4 = inlined_call_operand.hbm [shape: bf16[2,8,8,8], index: 4, kind: output, shape index: {0}]   ;;  %s3851_s5 = inlined_call_operand.hbm [shape: f32[2,1,1,8], index: 5, kind: output, shape index: {1}]   ;;  %s3852_s6 = inlined_call_operand.hbm [shape: f32[2,1,1,8], index: 6, kind: output, shape index: {2}]  }
   0x1   :  { %3867 = sst [smem:[#allocation24_spill]] %s3847_s1 }
   0x2   :  { %12 = vsyncpa [#allocation4], 0 }
   0x3   :  { %14 = vsyncpa [#allocation4 + $0x1], 0 }
   0x4   :  { %15 = vsyncpa [#allocation7], 0 }
   0x5   :  { %17 = vsyncpa [#allocation7 + $0x1], 0 }
   0x6   :  { %18 = vsyncpa [#allocation5], 0 }
   0x7   :  { %20 = vsyncpa [#allocation5 + $0x1], 0 }
   0x8   :  { %21 = vsyncpa [#allocation11], 0 }
   0x9   :  { %23 = vsyncpa [#allocation11 + $0x1], 0  ;;  %s2865_s21 = smov 0   ;;  %s2867_s22 = smov 0  }
   0xa   :  { %s2869_s23 = smov 0   ;;  %s2871_s24 = smov 0  }
   0xb   :  { %s2873_s25 = smov 0   ;;  %s2875_s26 = smov 0  }
   0xc LB: > { %3868 = sst [smem:[#allocation17_spill]] %s2795_s21  ;;  %s2896_s27 = sadd.s32 4294967295, %s2815_s26   ;;  %s2815_s26 = sphi %s2875_s26, %s29_s26   ;;  %s2811_s25 = sphi %s2873_s25, %s3907_s25   ;;  %s2807_s24 = sphi %s2871_s24, %s3906_s24   ;;  %s2803_s23 = sphi %s2869_s23, %s3905_s23   ;;  %s2799_s22 = sphi %s2867_s22, %s3909_s22   ;;  %s2795_s21 = sphi %s2865_s21, %s3908_s21  }
   0xd   : > { %3869 = sst [smem:[#allocation18_spill]] %s2803_s23  ;;  %s3853_s28 = sadd.s32 4294967294, %s2815_s26  }
   0xe   : > { %3870 = sst [smem:[#allocation19_spill]] %s2811_s25  ;;  %s41_s29 = sadd.s32 1, %s2811_s25 }
   0xf   : > { %3871 = sst [smem:[#allocation20_spill]] %s2815_s26  ;;  %s50_s30 = sadd.s32 1, %s2803_s23 }
  0x10   : > { %p43_p0 = scmp.ge.s32.totalorder %s41_s29, 2  ;;  %p57_p1 = scmp.ne.s32.totalorder %s2803_s23, %s2799_s22 }
  0x11   : > { %p58_p2 = scmp.eq.s32.totalorder %s2815_s26, 0  ;;  %p63_p3 = scmp.ne.s32.totalorder %s2799_s22, %s2795_s21 }
  0x12   : > { %s3911_s29 = smov (%p43_p0, %s41_s29), 0  ;;  %p64_p5 = scmp.eq.s32.totalorder %s2896_s27, 0 }
  0x13   : > { %3872 = sst [smem:[#allocation21_spill]] %s3911_s29  ;;  %p2908_p4 = por %p58_p2, %p57_p1 }
  0x14   : > { %s45_s8 = ssub.s32 %s2811_s25, %s3911_s29  ;;  %p182_p6 = scmp.eq.s32.totalorder %s2896_s27, 1 }
  0x15   : > { %p48_p7 = scmp.eq.s32.totalorder %s45_s8, 0  ;;  %p2916_p8 = por %p64_p5, %p63_p3 }
  0x16   : > { %p2920_p9 = por %p182_p6, %p57_p1  ;;  %p188_p10 = scmp.eq.s32.totalorder %s3853_s28, 1 }
  0x17   : > { %s3874_s9 = scalar_select %p2916_p8, 1, 0 }
  0x18   : > { %s3875_s10 = scalar_select %p2920_p9, 1, 0 }
  0x19   : > { %s2927_s11 = scalar_select %p48_p7, %s2803_s23, %s50_s30  }
  0x1a   : > { %p2929_p11 = por %p188_p10, %p63_p3  ;;  %p2440_p13 = scmp.lt.s32.totalorder %s2815_s26, 2 }
  0x1b   : > { %3876 = sst [smem:[#allocation22_spill]] %s2927_s11  ;;  %s2936_s13 = sand.u32 1, %s2803_s23  }
  0x1c   : > { %s3877_s12 = scalar_select %p2929_p11, 1, 0 }
  0x1d   : > { %s2939_s14 = sshll.u32 %s2811_s25, 11  ;;  %p2943_p0 = pnand %p2440_p13, %p2908_p4 }
  0x1e   : > { %3878 = sst [smem:[#allocation23_spill]] %s3877_s12  ;;  %s291_s16 = sand.u32 1, %s2815_s26  }
  0x1f   : > { %s2164_s17 = sshll.u32 %s2936_s13, 4  ;;  %s3880_s1 = sld [smem:[#allocation24_spill]] }
  0x20   : > { %s295_s30 = scalar_lea.vmem [#allocation6], %s2164_s17  ;;  %s2957_s7 = scalar_lea.vmem [#allocation8], %s2164_s17 }
  0x21   : > { %s308_s8 = sshll.u32 %s295_s30, 4  ;;  %s335_s28 = sshll.u32 %s2957_s7, 4  ;;  %s2955_s8 = int_to_ptr.vmem [resolvable:$true] %s308_s8  ;;  %s2995_s28 = int_to_ptr.vmem [resolvable:$true] %s335_s28 }
  0x22   : > { %s2960_s29 = scalar_lea.sflag [#allocation7], %s291_s16  ;;  %p2966_p2 = pneg %p2943_p0 }
  0x25   : > { %s2953_s20 = scalar_lea.hbm %s3880_s1, %s2939_s14  ;;  %s2584_s17 = scalar_lea.hbm %s3880_s1, 4096 }
  0x26   : > { %s2579_s25 = scalar_lea.hbm %s2953_s20, 256  ;;  %p2585_p5 = scmp.lt.u32.totalorder %s2953_s20, %s3880_s1 }
  0x27   : > { %p2580_p1 = scmp.ne.s32.totalorder %s2953_s20, %s2579_s25  ;;  %p2586_p6 = scmp.lt.u32.totalorder %s2584_s17, %s2579_s25 }
  0x28   : > { %p2588_p10 = scmp.lt.u32.totalorder %s2579_s25, %s2953_s20 }
  0x29   : > { %p2582_p3 = pnand %p2966_p2, %p2580_p1  ;;  %p2587_p7 = por %p2586_p6, %p2585_p5 }
  0x2b   : > { %p2583_p4 = pneg %p2582_p3  ;;  %p2589_p13 = por %p2588_p10, %p2587_p7 }
  0x2d   : > { %p2590_p12 = pnand %p2589_p13, %p2583_p4 }
  0x2f   : > { %2593 = shalt.err (!%p2590_p12)
}
  0x30   : > { %s2594_s16 = scalar_lea.vmem %s2955_s8, 256  ;;  %s2817_s19 = smov [#allocation6]  }
  0x31   : > { %p2595_p1 = scmp.ne.s32.totalorder %s2955_s8, %s2594_s16  ;;  %s2599_s30 = sshll.u32 %s2817_s19, 4  ;;  %s2600_s30 = int_to_ptr.vmem [resolvable:$false] %s2599_s30 }
  0x32   : > { %s2601_s23 = scalar_lea.vmem %s2600_s30, 512  ;;  %p2602_p9 = scmp.lt.s32.totalorder %s2955_s8, %s2600_s30 }
  0x33   : > { %p2597_p3 = pnand %p2595_p1, %p2966_p2  ;;  %p2603_p8 = scmp.lt.s32.totalorder %s2601_s23, %s2594_s16 }
  0x35   : > { %p2598_p11 = pneg %p2597_p3  ;;  %p2604_p5 = por %p2603_p8, %p2602_p9 }
  0x37   : > { %p2605_p6 = pnand %p2604_p5, %p2598_p11 }
  0x39   : > { %2608 = shalt.err (!%p2605_p6)
}
  0x3a   : > { %s3859_s25 = smov 128   ;;  %s3861_s11 = smov 8  }
  0x3b   : > { %2426 = dma.hbm_to_vmem [thread:$0]  (!%p2943_p0), %s2953_s20, 256, %s2955_s8, %s2960_s29, %s3859_s25, %s3859_s25, %s3861_s11  }
  0x3c   : > { %p2170_p8 = scmp.ge.s32.totalorder %s2815_s26, 1  ;;  %p343_p9 = scmp.lt.s32.totalorder %s2815_s26, 3 }
  0x3d   : > { %s2161_s16 = sshll.u32 %s2936_s13, 7  ;;  %s3008_s23 = scalar_lea.hbm %s3846_s0, %s2939_s14 }
  0x3e   : > { %p2999_p11 = pnand %p2170_p8, %p343_p9  ;;  %s271_s20 = scalar_lea.vmem [#allocation3], %s2161_s16 }
  0x3f   : > { %s281_s8 = sshll.u32 %s271_s20, 4  ;;  %s2330_s7 = sadd.s32 1792, %s2939_s14  ;;  %s3011_s8 = int_to_ptr.vmem [resolvable:$true] %s281_s8 }
  0x40   : > { %s3882_s17 = scalar_select %p2999_p11, 1, 0 }
  0x41   : > { %s3016_s1 = scalar_lea.hbm %s3848_s2, %s2330_s7  ;;  %s268_s26 = scalar_lea.sflag [#allocation4], %s2936_s13 }
  0x42   : > { %s2609_s12 = scalar_lea.hbm %s3008_s23, 2048  ;;  %s2614_s21 = scalar_lea.hbm %s3846_s0, 4096 }
  0x43   : > { %p2610_p12 = scmp.ne.s32.totalorder %s3008_s23, %s2609_s12  ;;  %p2615_p10 = scmp.lt.u32.totalorder %s3008_s23, %s3846_s0 }
  0x44   : > { %p2616_p13 = scmp.lt.u32.totalorder %s2614_s21, %s2609_s12  ;;  %p2618_p3 = scmp.lt.u32.totalorder %s2609_s12, %s3008_s23 }
  0x45   : > { %p2612_p4 = pnand %p2610_p12, %p2966_p2 }
  0x46   : > { %p2617_p1 = por %p2616_p13, %p2615_p10 }
  0x47   : > { %p2613_p7 = pneg %p2612_p4 }
  0x48   : > { %p2619_p5 = por %p2618_p3, %p2617_p1 }
  0x4a   : > { %p2620_p6 = pnand %p2619_p5, %p2613_p7 }
  0x4c   : > { %2623 = shalt.err (!%p2620_p6)
}
  0x4d   : > { %s2624_s14 = scalar_lea.vmem %s3011_s8, 2048  ;;  %s2820_s25 = smov [#allocation3]  }
  0x4e   : > { %p2625_p8 = scmp.ne.s32.totalorder %s3011_s8, %s2624_s14  ;;  %s2629_s11 = sshll.u32 %s2820_s25, 4  ;;  %s2630_s11 = int_to_ptr.vmem [resolvable:$false] %s2629_s11 }
  0x4f   : > { %s2631_s7 = scalar_lea.vmem %s2630_s11, 4096  ;;  %p2632_p4 = scmp.lt.s32.totalorder %s3011_s8, %s2630_s11 }
  0x50   : > { %p2627_p9 = pnand %p2625_p8, %p2966_p2  ;;  %p2633_p11 = scmp.lt.s32.totalorder %s2631_s7, %s2624_s14 }
  0x52   : > { %p2628_p12 = pneg %p2627_p9  ;;  %p2634_p10 = por %p2633_p11, %p2632_p4 }
  0x54   : > { %p2635_p13 = pnand %p2634_p10, %p2628_p12 }
  0x56   : > { %2638 = shalt.err (!%p2635_p13)
}
  0x57   : > { %s3883_s21 = smov 8   ;;  %s3884_s12 = smov 128  }
  0x58   : > { %2423 = dma.hbm_to_vmem [thread:$0]  (!%p2943_p0), %s3008_s23, 2048, %s3011_s8, %s268_s26, %s3884_s12, %s3884_s12, %s3883_s21  }
  0x59   : > { %s2639_s19 = scalar_lea.hbm %s3016_s1, 256  ;;  %s2644_s20 = scalar_lea.hbm %s3848_s2, 4096 }
  0x5a   : > { %p2640_p7 = scmp.ne.s32.totalorder %s3016_s1, %s2639_s19  ;;  %p2645_p3 = scmp.lt.u32.totalorder %s3016_s1, %s3848_s2 }
  0x5b   : > { %p2646_p5 = scmp.lt.u32.totalorder %s2644_s20, %s2639_s19  ;;  %p2648_p8 = scmp.lt.u32.totalorder %s2639_s19, %s3016_s1 }
  0x5c   : > { %p2642_p11 = pnand %p2640_p7, %p2966_p2 }
  0x5d   : > { %p2647_p6 = por %p2646_p5, %p2645_p3 }
  0x5e   : > { %p2643_p1 = pneg %p2642_p11 }
  0x5f   : > { %p2649_p9 = por %p2648_p8, %p2647_p6 }
  0x61   : > { %p2650_p12 = pnand %p2649_p9, %p2643_p1 }
  0x63   : > { %2653 = shalt.err (!%p2650_p12)
}
  0x64   : > { %s2654_s26 = scalar_lea.vmem %s2995_s28, 256  ;;  %s2821_s13 = smov [#allocation8]  }
  0x65   : > { %p2655_p4 = scmp.ne.s32.totalorder %s2995_s28, %s2654_s26  ;;  %s2659_s23 = sshll.u32 %s2821_s13, 4  ;;  %s2660_s23 = int_to_ptr.vmem [resolvable:$false] %s2659_s23 }
  0x66   : > { %s2661_s8 = scalar_lea.vmem %s2660_s23, 512  ;;  %p2662_p7 = scmp.lt.s32.totalorder %s2995_s28, %s2660_s23 }
  0x67   : > { %p2657_p10 = pnand %p2655_p4, %p2966_p2  ;;  %p2663_p11 = scmp.lt.s32.totalorder %s2661_s8, %s2654_s26 }
  0x69   : > { %p2658_p13 = pneg %p2657_p10  ;;  %p2664_p3 = por %p2663_p11, %p2662_p7 }
  0x6b   : > { %p2665_p5 = pnand %p2664_p3, %p2658_p13 }
  0x6d   : > { %2668 = shalt.err (!%p2665_p5)
}
  0x6e   : > { %2429 = dma.hbm_to_vmem [thread:$0]  (!%p2943_p0), %s3016_s1, 256, %s2995_s28, %s2960_s29, %s3884_s12, %s3884_s12, %s3883_s21  }
  0x6f   : > { %p3885_p2 = scmp.ne.s32.totalorder %s3882_s17, 0 }
  0x70   : > { %s3073_s18 = sand.u32 (!%p3885_p2), 1, %s2799_s22   ;;  %p3886_p1 = scmp.ne.s32.totalorder (!%p3885_p2), %s3874_s9, 0 }
  0x71   : > { %347 = sbr.rel (%p3885_p2) target bundleno = 787 (0x313), region = 36  ;;  %s2171_s11 = sshll.u32 (!%p3885_p2), %s3073_s18, 7 }
  0x72   : > { %s350_s7 = scalar_lea.sflag (!%p3885_p2), [#allocation4], %s3073_s18  ;;  %s3077_s19 = scalar_lea.vmem (!%p3885_p2), [#allocation3], %s2171_s11 }
  0x78   : > { %2778 = dma.done.wait (%p3886_p1), %s350_s7, 2048  }
  0x79   : > { %2780 = vsyncadd (%p3886_p1), %s350_s7, 4294965248  ;;  %s358_s1 = sand.u32 1, %s2896_s27  }
  0x7a   : > { %s359_s28 = scalar_lea.sflag [#allocation7], %s358_s1 }
  0x7b   : > { %2782 = dma.done.wait (%p3886_p1), %s359_s28, 512  }
  0x7c   : > { %2784 = vsyncadd (%p3886_p1), %s359_s28, 4294966784  ;;  %v429_v0 = vld [vmem:[%s3077_s19] sm:$0xff]  ;;  %v430_v1 = vld [vmem:[%s3077_s19 + $0x8] sm:$0xff]  ;;  %vm519_vm0 = vcmask 24576   ;;  %vm520_vm1 = vsmask.f32 256 }
  0x7d   : > { %v431_v2 = vld [vmem:[%s3077_s19 + $0x10] sm:$0xff]  ;;  %v432_v3 = vld [vmem:[%s3077_s19 + $0x18] sm:$0xff]  ;;  %v3094_v4 = vmax.f32 %v429_v0, %v430_v1  ;;  %v433_v5 = vld [vmem:[%s3077_s19 + $0x20] sm:$0xff]  ;;  %v2822_v7 = vmov 0.0|0.0   ;;  %vm552_vm2 = vsmask.f32 7938 }
  0x7e   : > { %v434_v6 = vld [vmem:[%s3077_s19 + $0x28] sm:$0xff]  ;;  %v3098_v8 = vcombine.low %v2822_v7, %v2822_v7  ;;  %v3100_v9 = vmax.f32 %v431_v2, %v432_v3  ;;  %v435_v10 = vld [vmem:[%s3077_s19 + $0x30] sm:$0xff]  ;;  %v436_v11 = vld [vmem:[%s3077_s19 + $0x38] sm:$0xff]  ;;  %s2823_s29 = smov 124   ;;  %vm598_vm5 = vcmask 27648   ;;  %s2824_s9 = smov 8  }
  0x7f   : > { %v3104_v12 = vmax.f32 %v433_v5, %v434_v6  ;;  %v437_v13 = vld [vmem:[%s3077_s19 + $0x40] sm:$0xff]  ;;  %v3107_v14 = vmax.f32 %v435_v10, %v436_v11  ;;  %v438_v15 = vld [vmem:[%s3077_s19 + $0x48] sm:$0xff]  ;;  %v439_v16 = vld [vmem:[%s3077_s19 + $0x50] sm:$0xff]  ;;  %s2825_s15 = smov 4   ;;  %vm1309_vm7 = vcmask 1045504   ;;  %vm893_vm8 = vcmask 31744  }
  0x80   : > { %v440_v17 = vld [vmem:[%s3077_s19 + $0x58] sm:$0xff]  ;;  %v2497_v18 = vpack.i.bf16 %v3100_v9, %v3094_v4  ;;  %v3114_v19 = vmax.f32 %v437_v13, %v438_v15  ;;  %v441_v20 = vld [vmem:[%s3077_s19 + $0x60] sm:$0xff]  ;;  %v442_v21 = vld [vmem:[%s3077_s19 + $0x68] sm:$0xff]  ;;  %v589_v29 = vshrl.u32 %v3098_v8, 16  ;;  %v592_v1 = vshll.u32 %v3098_v8, 16  ;;  %s2174_s14 = sshll.u32 %s3073_s18, 5 }
  0x81   : > { %v3118_v22 = vmax.f32 %v439_v16, %v440_v17  ;;  %vm3122_vm3 = vmand %vm519_vm0, %vm520_vm1  ;;  %v3126_v24 = vmax.f32 %v441_v20, %v442_v21  ;;  %v443_v25 = vld [vmem:[%s3077_s19 + $0x70] sm:$0xff]  ;;  %v444_v26 = vld [vmem:[%s3077_s19 + $0x78] sm:$0xff]  ;;  %v2502_v30 = vpack.i.bf16 %v3107_v14, %v3104_v12  ;;  %vm918_vm9 = vcmask 64512   ;;  %s3652_s25 = scalar_lea.vmem [#allocation9], %s2174_s14  ;;  %s2339_s26 = sshll.u32 %s2807_s24, 9 }
  0x82   : > { %v525_v27 = vld [vmem:[#allocation2 + $0x8] sm:$0x1]  ;;  %v528_v28 = vld [vmem:[#allocation2 + $0x10] sm:$0x1]  ;;  %2498 = vrot.lane.b32.xlu0 %v2497_v18, %s2823_s29  ;;  %469 = vrot.lane.b32.xlu1 %v3114_v19, %s2823_s29  ;;  %vm3142_vm4 = vmand %vm519_vm0, %vm552_vm2  ;;  %v3162_v49 = vmax.f32 %v443_v25, %v444_v26  ;;  %v3182_v0 = vrot.slane %v589_v29, 7  ;;  %vm1296_vm13 = vcmask 97280   ;;  %s3697_s11 = scalar_lea.hbm %s3850_s4, %s2339_s26 }
  0x83   : > { %v526_v31 = vsel %vm3122_vm3, 0, %v525_v27  ;;  %v529_v32 = vsel %vm3122_vm3, 0, %v528_v28  ;;  %v557_v34 = vld [vmem:[#allocation2 + $0xc] sm:$0x1]  ;;  %v560_v35 = vld [vmem:[#allocation2 + $0x14] sm:$0x1]  ;;  %v2507_v36 = vpack.i.bf16 %v3126_v24, %v3118_v22  ;;  %vm3192_vm6 = vmand %vm598_vm5, %vm552_vm2 }
  0x84   : > { %527 = vst [vmem:[#allocation2 + $0x8] sm:$0x1] %v526_v31  ;;  %530 = vst [vmem:[#allocation2 + $0x10] sm:$0x1] %v529_v32  ;;  %v558_v37 = vsel %vm3142_vm4, 0, %v557_v34  ;;  %v561_v38 = vsel %vm3142_vm4, 0, %v560_v35  ;;  %v3188_v5 = vor.u32 %v592_v1, %v3182_v0 }
  0x85   : > { %v531_v39 = vld [vmem:[#allocation2 + $0x18] sm:$0x1]  ;;  %v534_v40 = vld [vmem:[#allocation2 + $0x20] sm:$0x1]  ;;  %559 = vst [vmem:[#allocation2 + $0xc] sm:$0x1] %v558_v37 }
  0x86   : > { %562 = vst [vmem:[#allocation2 + $0x14] sm:$0x1] %v561_v38  ;;  %v532_v41 = vsel %vm3122_vm3, 0, %v531_v39  ;;  %v535_v42 = vsel %vm3122_vm3, 0, %v534_v40  ;;  %v563_v43 = vld [vmem:[#allocation2 + $0x1c] sm:$0x1]  ;;  %2503 = vrot.lane.b32.xlu0 %v2502_v30, %s2823_s29  ;;  %2508 = vrot.lane.b32.xlu1 %v2507_v36, %s2823_s29 }
  0x87   : > { %v566_v44 = vld [vmem:[#allocation2 + $0x24] sm:$0x1]  ;;  %533 = vst [vmem:[#allocation2 + $0x18] sm:$0x1] %v532_v41  ;;  %536 = vst [vmem:[#allocation2 + $0x20] sm:$0x1] %v535_v42 }
  0x88   : > { %v564_v45 = vsel %vm3142_vm4, 0, %v563_v43  ;;  %v567_v46 = vsel %vm3142_vm4, 0, %v566_v44  ;;  %v537_v47 = vld [vmem:[#allocation2 + $0x28] sm:$0x1]  ;;  %v569_v48 = vld [vmem:[#allocation2 + $0x2c] sm:$0x1] }
  0x89   : > { %565 = vst [vmem:[#allocation2 + $0x1c] sm:$0x1] %v564_v45  ;;  %568 = vst [vmem:[#allocation2 + $0x24] sm:$0x1] %v567_v46  ;;  %v538_v50 = vsel %vm3122_vm3, 0, %v537_v47  ;;  %v570_v51 = vsel %vm3142_vm4, 0, %v569_v48 }
  0x8a   : > { %v549_v52 = vld [vmem:[#allocation2 + $0x48] sm:$0x1]  ;;  %v581_v53 = vld [vmem:[#allocation2 + $0x4c] sm:$0x1]  ;;  %539 = vst [vmem:[#allocation2 + $0x28] sm:$0x1] %v538_v50  ;;  %475 = vrot.lane.b32.xlu0 %v3162_v49, %s2823_s29 }
  0x8b   : > { %571 = vst [vmem:[#allocation2 + $0x2c] sm:$0x1] %v570_v51  ;;  %v540_v54 = vld [vmem:[#allocation2 + $0x30] sm:$0x1]  ;;  %v543_v55 = vld [vmem:[#allocation2 + $0x38] sm:$0x1] }
  0x8c   : > { %v572_v56 = vld [vmem:[#allocation2 + $0x34] sm:$0x1]  ;;  %v541_v57 = vsel %vm3122_vm3, 0, %v540_v54  ;;  %v544_v58 = vsel %vm3122_vm3, 0, %v543_v55  ;;  %v575_v60 = vld [vmem:[#allocation2 + $0x3c] sm:$0x1] }
  0x8d   : > { %v573_v59 = vsel %vm3142_vm4, 0, %v572_v56  ;;  %v550_v61 = vsel %vm3122_vm3, 0, %v549_v52  ;;  %542 = vst [vmem:[#allocation2 + $0x30] sm:$0x1] %v541_v57  ;;  %545 = vst [vmem:[#allocation2 + $0x38] sm:$0x1] %v544_v58 }
  0x8e   : > { %574 = vst [vmem:[#allocation2 + $0x34] sm:$0x1] %v573_v59  ;;  %v576_v62 = vsel %vm3142_vm4, 0, %v575_v60  ;;  %551 = vst [vmem:[#allocation2 + $0x48] sm:$0x1] %v550_v61  ;;  %v582_v63 = vsel %vm3142_vm4, 0, %v581_v53 }
  0x8f   : > { %577 = vst [vmem:[#allocation2 + $0x3c] sm:$0x1] %v576_v62  ;;  %583 = vst [vmem:[#allocation2 + $0x4c] sm:$0x1] %v582_v63  ;;  %v546_v2 = vld [vmem:[#allocation2 + $0x40] sm:$0x1] }
  0x90   : > { %v547_v3 = vsel %vm3122_vm3, 0, %v546_v2  ;;  %v595_v6 = vrot.slane %v3182_v0, 4  ;;  %v578_v7 = vld [vmem:[#allocation2 + $0x44] sm:$0x1]  ;;  %v740_v52 = vld [vmem:[#allocation2 + $0x8] sm:$0xf] }
  0x91   : > { %548 = vst [vmem:[#allocation2 + $0x40] sm:$0x1] %v547_v3  ;;  %v579_v8 = vsel %vm3142_vm4, 0, %v578_v7  ;;  %v746_v53 = vld [vmem:[#allocation2 + $0x10] sm:$0xf]  ;;  %vm1691_vm14 = vcmask 1042432  }
  0x92   : > { %580 = vst [vmem:[#allocation2 + $0x44] sm:$0x1] %v579_v8  ;;  %v743_v58 = vld [vmem:[#allocation2 + $0xc] sm:$0x1]  ;;  %v749_v59 = vld [vmem:[#allocation2 + $0x14] sm:$0x1] }
  0x93   : > { %v767_v3 = vld [vmem:[#allocation2 + $0x2c] sm:$0x1]  ;;  %vm1161_vm10 = vsmask.f32 3328  ;;  %vm1162_vm11 = vsmask.f32 7440 }
  0x94   : > { %v2568_v23 = vld [vmem:[%s3849_s3 + $0x8] sm:$0x3f]   ;;  %vm3517_vm12 = vmor %vm1161_vm10, %vm1162_vm11  ;;  %vm1692_vm15 = vcmask 1046532   ;;  %vm1905_vm1 = vcmask 60416   ;;  %s1938_s13 = sshll.u32 %s3652_s25, 4  ;;  %s1915_s7 = scalar_lea.sflag [#allocation5], %s3073_s18  ;;  %s3705_s13 = int_to_ptr.vmem [resolvable:$true] %s1938_s13 }
  0x95   : > { %v621_v11 = vld [vmem:[#allocation2 + $0x48] sm:$0xf]  ;;  %2404 = vmatprep.subr.msk.bf16.mxu1 %vm1309_vm7, %v2568_v23  ;;  %vm3585_vm0 = vmor %vm1691_vm14, %vm1692_vm15  ;;  %s2669_s19 = scalar_lea.vmem %s3705_s13, 512  ;;  %p3897_p6 = scmp.ne.s32.totalorder %s3875_s10, 0 }
  0x96   : > { %v624_v13 = vld [vmem:[#allocation2 + $0x4c] sm:$0x1]  ;;  %v622_v15 = vsel %vm3192_vm6, %v3188_v5, %v621_v11  ;;  %p2670_p0 = scmp.ne.s32.totalorder %s3705_s13, %s2669_s19  ;;  %s2826_s28 = smov [#allocation9]  }
  0x97   : > { %v625_v16 = vsel %vm3122_vm3, %v595_v6, %v624_v13  ;;  %623 = vst [vmem:[#allocation2 + $0x48] sm:$0xf] %v622_v15  ;;  %v522_v15 = vld [vmem:[#allocation2] sm:$0x1]  ;;  %s2673_s29 = sshll.u32 %s2826_s28, 4  ;;  %s2674_s29 = int_to_ptr.vmem [resolvable:$false] %s2673_s29 }
  0x98   : > { %626 = vst [vmem:[#allocation2 + $0x4c] sm:$0x1] %v625_v16  ;;  %p2671_p8 = pnand %p2670_p0, %p3897_p6  ;;  %p2676_p12 = scmp.lt.s32.totalorder %s3705_s13, %s2674_s29 }
  0x9a   : > { %p2672_p9 = pneg %p2671_p8 }
  0x9e   : > { %v3205_v17 = vld [vmem:[#allocation2 + $0x48] sm:$0xf] }
  0x9f   : > { %v960_v18 = vld [vmem:[#allocation2 + $0x4c] sm:$0x1]  ;;  %v1506_v20 = vld [vmem:[#allocation2 + $0x48] sm:$0xe] }
  0xa0   : > { %v2224_v21 = vcombine.low %v3205_v17, %v960_v18  ;;  %v2284_v25 = vcombine.low %v1506_v20, %v960_v18  ;;  %v752_v20 = vld [vmem:[#allocation2 + $0x18] sm:$0xf] }
  0xa2   : > { %1079 = vrot.lane.b32.xlu0 %v2224_v21, %s2824_s9  ;;  %v758_v21 = vld [vmem:[#allocation2 + $0x20] sm:$0xf] }
  0xa6   : > { %1609 = vrot.lane.b32.xlu0 %v2284_v25, %s2824_s9 }
  0xf4   : > { %v2499_v26 = vpop.permute.xlu0 %2498  ;;  %v470_v27 = vpop.permute.xlu1 %469 }
  0xf5   : > { %v2501_v28 = vunpack.i.h.bf16 %v2499_v26  ;;  %v2500_v29 = vunpack.i.l.bf16 %v2499_v26  ;;  %v489_v30 = vmax.f32 %v3114_v19, %v470_v27 }
  0xf7   : > { %v486_v31 = vmax.f32 %v3100_v9, %v2501_v28  ;;  %v485_v32 = vmax.f32 %v3094_v4, %v2500_v29  ;;  %v2335_v34 = vpack.c.bf16 %v489_v30, %v489_v30  ;;  %v755_v29 = vld [vmem:[#allocation2 + $0x1c] sm:$0x1]  ;;  %v761_v30 = vld [vmem:[#allocation2 + $0x24] sm:$0x1] }
  0xf8   : > { %v2504_v35 = vpop.permute.xlu0 %2503  ;;  %v2509_v36 = vpop.permute.xlu1 %2508 }
  0xf9   : > { %v2332_v37 = vpack.c.bf16 %v486_v31, %v486_v31  ;;  %v2331_v38 = vpack.c.bf16 %v485_v32, %v485_v32  ;;  %v2506_v39 = vunpack.i.h.bf16 %v2504_v35  ;;  %v2505_v40 = vunpack.i.l.bf16 %v2504_v35 }
  0xfa   : > { %v692_v41 = vshrl.u32 %v2335_v34, 16  ;;  %v695_v42 = vshll.u32 %v2335_v34, 16  ;;  %v2511_v43 = vunpack.i.h.bf16 %v2509_v36  ;;  %v2510_v44 = vunpack.i.l.bf16 %v2509_v36 }
  0xfb   : > { %v668_v45 = vshrl.u32 %v2332_v37, 16  ;;  %v671_v46 = vshll.u32 %v2332_v37, 16  ;;  %v660_v47 = vshrl.u32 %v2331_v38, 16  ;;  %v663_v48 = vshll.u32 %v2331_v38, 16 }
  0xfc   : > { %v488_v19 = vmax.f32 %v3107_v14, %v2506_v39  ;;  %v487_v9 = vmax.f32 %v3104_v12, %v2505_v40  ;;  %v694_v4 = vrot.slane %v692_v41, 7  ;;  %v491_v50 = vmax.f32 %v3126_v24, %v2511_v43  ;;  %v476_v51 = vpop.permute.xlu0 %475  ;;  %v764_v24 = vld [vmem:[#allocation2 + $0x28] sm:$0xf] }
  0xfd   : > { %v670_v54 = vrot.slane %v668_v45, 7  ;;  %v662_v55 = vrot.slane %v660_v47, 7  ;;  %v490_v56 = vmax.f32 %v3118_v22, %v2510_v44  ;;  %v492_v57 = vmax.f32 %v3162_v49, %v476_v51  ;;  %v554_v44 = vld [vmem:[#allocation2 + $0x4] sm:$0x1] }
  0xfe   : > { %v2334_v60 = vpack.c.bf16 %v488_v19, %v488_v19  ;;  %v2333_v61 = vpack.c.bf16 %v487_v9, %v487_v9  ;;  %v697_v62 = vor.u32 %v695_v42, %v694_v4  ;;  %v698_v14 = vrot.slane %v694_v4, 4  ;;  %v770_v19 = vld [vmem:[#allocation2 + $0x30] sm:$0xf]  ;;  %v773_v9 = vld [vmem:[#allocation2 + $0x34] sm:$0x1] }
  0xff   : > { %v673_v63 = vor.u32 %v671_v46, %v670_v54  ;;  %v674_v12 = vrot.slane %v670_v54, 4  ;;  %v665_v1 = vor.u32 %v663_v48, %v662_v55  ;;  %v666_v2 = vrot.slane %v662_v55, 4 }
 0x100   : > { %v684_v7 = vshrl.u32 %v2334_v60, 16  ;;  %v687_v8 = vshll.u32 %v2334_v60, 16  ;;  %v676_v11 = vshrl.u32 %v2333_v61, 16  ;;  %v679_v13 = vshll.u32 %v2333_v61, 16 }
 0x101   : > { %v747_v22 = vsel %vm3192_vm6, %v673_v63, %v746_v53  ;;  %v750_v49 = vsel %vm3122_vm3, %v674_v12, %v749_v59  ;;  %v741_v16 = vsel %vm3192_vm6, %v665_v1, %v740_v52  ;;  %v744_v18 = vsel %vm3122_vm3, %v666_v2, %v743_v58  ;;  %v776_v52 = vld [vmem:[#allocation2 + $0x38] sm:$0xf]  ;;  %v779_v53 = vld [vmem:[#allocation2 + $0x3c] sm:$0x1] }
 0x102   : > { %748 = vst [vmem:[#allocation2 + $0x10] sm:$0xf] %v747_v22  ;;  %751 = vst [vmem:[#allocation2 + $0x14] sm:$0x1] %v750_v49  ;;  %v686_v25 = vrot.slane %v684_v7, 7  ;;  %v678_v26 = vrot.slane %v676_v11, 7  ;;  %v765_v27 = vsel %vm3192_vm6, %v697_v62, %v764_v24  ;;  %v768_v28 = vsel %vm3122_vm3, %v698_v14, %v767_v3 }
 0x103   : > { %742 = vst [vmem:[#allocation2 + $0x8] sm:$0xf] %v741_v16  ;;  %745 = vst [vmem:[#allocation2 + $0xc] sm:$0x1] %v744_v18  ;;  %v2337_v31 = vpack.c.bf16 %v491_v50, %v491_v50  ;;  %v2336_v32 = vpack.c.bf16 %v490_v56, %v490_v56  ;;  %v2338_v34 = vpack.c.bf16 %v492_v57, %v492_v57  ;;  %v523_v35 = vsel %vm3122_vm3, 0, %v522_v15 }
 0x104   : > { %766 = vst [vmem:[#allocation2 + $0x28] sm:$0xf] %v765_v27  ;;  %769 = vst [vmem:[#allocation2 + $0x2c] sm:$0x1] %v768_v28  ;;  %v689_v36 = vor.u32 %v687_v8, %v686_v25  ;;  %v690_v37 = vrot.slane %v686_v25, 4  ;;  %v681_v38 = vor.u32 %v679_v13, %v678_v26  ;;  %v682_v39 = vrot.slane %v678_v26, 4 }
 0x105   : > { %524 = vst [vmem:[#allocation2] sm:$0x1] %v523_v35  ;;  %v708_v40 = vshrl.u32 %v2337_v31, 16  ;;  %v711_v41 = vshll.u32 %v2337_v31, 16  ;;  %v700_v42 = vshrl.u32 %v2336_v32, 16  ;;  %v703_v43 = vshll.u32 %v2336_v32, 16 }
 0x106   : > { %v759_v45 = vsel %vm3192_vm6, %v689_v36, %v758_v21  ;;  %v762_v46 = vsel %vm3122_vm3, %v690_v37, %v761_v30  ;;  %v753_v47 = vsel %vm3192_vm6, %v681_v38, %v752_v20  ;;  %v756_v48 = vsel %vm3122_vm3, %v682_v39, %v755_v29  ;;  %v782_v3 = vld [vmem:[#allocation2 + $0x40] sm:$0xf]  ;;  %v785_v7 = vld [vmem:[#allocation2 + $0x44] sm:$0x1] }
 0x107   : > { %760 = vst [vmem:[#allocation2 + $0x20] sm:$0xf] %v759_v45  ;;  %763 = vst [vmem:[#allocation2 + $0x24] sm:$0x1] %v762_v46  ;;  %v710_v4 = vrot.slane %v708_v40, 7  ;;  %v702_v50 = vrot.slane %v700_v42, 7 }
 0x108   : > { %754 = vst [vmem:[#allocation2 + $0x18] sm:$0xf] %v753_v47  ;;  %757 = vst [vmem:[#allocation2 + $0x1c] sm:$0x1] %v756_v48  ;;  %v716_v51 = vshrl.u32 %v2338_v34, 16  ;;  %v719_v54 = vshll.u32 %v2338_v34, 16 }
 0x109   : > { %v555_v55 = vsel %vm3142_vm4, 0, %v554_v44  ;;  %v713_v56 = vor.u32 %v711_v41, %v710_v4  ;;  %v714_v57 = vrot.slane %v710_v4, 4  ;;  %v705_v58 = vor.u32 %v703_v43, %v702_v50  ;;  %v3242_v60 = vld [vmem:[#allocation2 + $0x10] sm:$0xf]  ;;  %v3244_v61 = vld [vmem:[#allocation2 + $0x14] sm:$0x1] }
 0x10a   : > { %v706_v59 = vrot.slane %v702_v50, 4  ;;  %556 = vst [vmem:[#allocation2 + $0x4] sm:$0x1] %v555_v55  ;;  %v718_v62 = vrot.slane %v716_v51, 7  ;;  %v2210_v14 = vcombine.low %v3242_v60, %v3244_v61  ;;  %v3248_v63 = vld [vmem:[#allocation2 + $0x8] sm:$0xf] }
 0x10b   : > { %v3250_v12 = vld [vmem:[#allocation2 + $0xc] sm:$0x1]  ;;  %v777_v33 = vsel %vm3192_vm6, %v713_v56, %v776_v52  ;;  %v780_v1 = vsel %vm3122_vm3, %v714_v57, %v779_v53  ;;  %v771_v2 = vsel %vm3192_vm6, %v705_v58, %v770_v19  ;;  %v3285_v28 = vld [vmem:[#allocation2 + $0x10] sm:$0xf]  ;;  %v3287_v29 = vld [vmem:[#allocation2 + $0x14] sm:$0x1]  ;;  %v2186_v58 = vcombine.low %v3242_v60, %v3242_v60 }
 0x10c   : > { %v774_v24 = vsel %vm3122_vm3, %v706_v59, %v773_v9  ;;  %778 = vst [vmem:[#allocation2 + $0x38] sm:$0xf] %v777_v33  ;;  %781 = vst [vmem:[#allocation2 + $0x3c] sm:$0x1] %v780_v1  ;;  %v721_v8 = vor.u32 %v719_v54, %v718_v62  ;;  %v722_v11 = vrot.slane %v718_v62, 4  ;;  %1027 = vrot.lane.b32.xlu0 %v2210_v14, %s2825_s15  ;;  %v1311_v53 = vsel %vm1309_vm7, %v2568_v23, 0 }
 0x10d   : > { %772 = vst [vmem:[#allocation2 + $0x30] sm:$0xf] %v771_v2  ;;  %775 = vst [vmem:[#allocation2 + $0x34] sm:$0x1] %v774_v24  ;;  %v2209_v13 = vcombine.low %v3248_v63, %v3250_v12  ;;  %v3290_v30 = vld [vmem:[#allocation2 + $0x28] sm:$0xf]  ;;  %v2217_v34 = vcombine.low %v3285_v28, %v3287_v29  ;;  %2357 = vmatpush3.bf16.msra.mxu1 %v1311_v53  ;;  %v2185_v14 = vcombine.low %v3248_v63, %v3248_v63 }
 0x10e   : > { %v783_v15 = vsel %vm3192_vm6, %v721_v8, %v782_v3  ;;  %v786_v22 = vsel %vm3122_vm3, %v722_v11, %v785_v7  ;;  %v3268_v49 = vld [vmem:[#allocation2 + $0x20] sm:$0xf]  ;;  %v3270_v16 = vld [vmem:[#allocation2 + $0x24] sm:$0x1]  ;;  %v3292_v31 = vld [vmem:[#allocation2 + $0x2c] sm:$0x1]  ;;  %v2196_v2 = vcombine.low %v3290_v30, %v3290_v30  ;;  %v2193_v24 = vcombine.low %v3285_v28, %v3285_v28 }
 0x10f   : > { %1025 = vrot.lane.b32.xlu1 %v2209_v13, %s2825_s15  ;;  %v3272_v18 = vld [vmem:[#allocation2 + $0x18] sm:$0xf]  ;;  %784 = vst [vmem:[#allocation2 + $0x40] sm:$0xf] %v783_v15  ;;  %787 = vst [vmem:[#allocation2 + $0x44] sm:$0x1] %v786_v22  ;;  %v2212_v20 = vcombine.low %v3268_v49, %v3270_v16  ;;  %v2220_v35 = vcombine.low %v3290_v30, %v3292_v31  ;;  %v2188_v62 = vcombine.low %v3268_v49, %v3268_v49 }
 0x110   : > { %v3276_v21 = vld [vmem:[#allocation2 + $0x1c] sm:$0x1]  ;;  %v3280_v26 = vld [vmem:[#allocation2 + $0x18] sm:$0xf]  ;;  %v3301_v36 = vld [vmem:[#allocation2 + $0x20] sm:$0xf]  ;;  %v2187_v63 = vcombine.low %v3272_v18, %v3272_v18 }
 0x111   : > { %v2211_v25 = vcombine.low %v3272_v18, %v3276_v21  ;;  %v3282_v27 = vld [vmem:[#allocation2 + $0x1c] sm:$0x1]  ;;  %1031 = vrot.lane.b32.xlu0 %v2212_v20, %s2825_s15  ;;  %v3303_v37 = vld [vmem:[#allocation2 + $0x24] sm:$0x1]  ;;  %v3315_v42 = vld [vmem:[#allocation2 + $0x28] sm:$0xf]  ;;  %v2194_v60 = vcombine.low %v3280_v26, %v3280_v26  ;;  %v2195_v8 = vcombine.low %v3301_v36, %v3301_v36 }
 0x112   : > { %v2218_v32 = vcombine.low %v3280_v26, %v3282_v27  ;;  %v2219_v40 = vcombine.low %v3301_v36, %v3303_v37  ;;  %v3317_v43 = vld [vmem:[#allocation2 + $0x2c] sm:$0x1]  ;;  %v600_v44 = vld [vmem:[#allocation2] sm:$0xf]  ;;  %v603_v48 = vld [vmem:[#allocation2 + $0x4] sm:$0x1] }
 0x113   : > { %1029 = vrot.lane.b32.xlu1 %v2211_v25, %s2825_s15  ;;  %v601_v47 = vsel %vm3192_vm6, %v3188_v5, %v600_v44  ;;  %v604_v19 = vsel %vm3122_vm3, %v595_v6, %v603_v48  ;;  %v2213_v9 = vcombine.low %v3315_v42, %v3317_v43  ;;  %v3336_v50 = vld [vmem:[#allocation2 + $0x38] sm:$0xf]  ;;  %v3338_v10 = vld [vmem:[#allocation2 + $0x3c] sm:$0x1]  ;;  %v2569_v33 = vld [vmem:[%s3849_s3] sm:$0x3f]  }
 0x114   : > { %v3306_v38 = vld [vmem:[#allocation2 + $0x30] sm:$0xf]  ;;  %v3308_v39 = vld [vmem:[#allocation2 + $0x34] sm:$0x1]  ;;  %602 = vst [vmem:[#allocation2] sm:$0xf] %v601_v47  ;;  %v2215_v0 = vcombine.low %v3336_v50, %v3338_v10  ;;  %2405 = vmatprep.subr.msk.bf16.mxu0 %vm1309_vm7, %v2569_v33  ;;  %2406 = vmatprep.subr.msk.bf16.mxu1 %vm1309_vm7, %v2569_v33 }
 0x115   : > { %1067 = vrot.lane.b32.xlu0 %v2218_v32, %s2824_s9  ;;  %v2214_v41 = vcombine.low %v3306_v38, %v3308_v39  ;;  %605 = vst [vmem:[#allocation2 + $0x4] sm:$0x1] %v604_v19  ;;  %v3346_v5 = vld [vmem:[#allocation2 + $0x38] sm:$0xf]  ;;  %v3348_v6 = vld [vmem:[#allocation2 + $0x3c] sm:$0x1] }
 0x116   : > { %v3320_v45 = vld [vmem:[#allocation2 + $0x40] sm:$0xf]  ;;  %v3322_v46 = vld [vmem:[#allocation2 + $0x44] sm:$0x1]  ;;  %v3351_v51 = vld [vmem:[#allocation2 + $0x30] sm:$0xf]  ;;  %v2222_v54 = vcombine.low %v3346_v5, %v3348_v6 }
 0x117   : > { %1065 = vrot.lane.b32.xlu1 %v2217_v34, %s2824_s9  ;;  %v2216_v4 = vcombine.low %v3320_v45, %v3322_v46  ;;  %v3353_v52 = vld [vmem:[#allocation2 + $0x34] sm:$0x1]  ;;  %v3363_v56 = vld [vmem:[#allocation2 + $0x40] sm:$0xf]  ;;  %v3365_v57 = vld [vmem:[#allocation2 + $0x44] sm:$0x1]  ;;  %v2192_v48 = vcombine.low %v3320_v45, %v3320_v45  ;;  %v2191_v45 = vcombine.low %v3336_v50, %v3336_v50 }
 0x118   : > { %v2221_v55 = vcombine.low %v3351_v51, %v3353_v52  ;;  %v2223_v59 = vcombine.low %v3363_v56, %v3365_v57  ;;  %v3387_v1 = vsel %vm1309_vm7, %v2569_v33, 0  ;;  %v1492_v3 = vld [vmem:[#allocation2 + $0x10] sm:$0xe]  ;;  %v1494_v11 = vld [vmem:[#allocation2 + $0x20] sm:$0xe] }
 0x119   : > { %1071 = vrot.lane.b32.xlu0 %v2220_v35, %s2824_s9  ;;  %2367 = vmatpush3.bf16.msra.mxu0 %v3387_v1  ;;  %v2270_v7 = vcombine.low %v1492_v3, %v3244_v61  ;;  %v1491_v13 = vld [vmem:[#allocation2 + $0x8] sm:$0xe]  ;;  %v2272_v15 = vcombine.low %v1494_v11, %v3270_v16  ;;  %v1500_v49 = vld [vmem:[#allocation2 + $0x18] sm:$0xe]  ;;  %v1499_v26 = vld [vmem:[#allocation2 + $0x10] sm:$0xe] }
 0x11a   : > { %v2269_v22 = vcombine.low %v1491_v13, %v3250_v12  ;;  %v1493_v18 = vld [vmem:[#allocation2 + $0x18] sm:$0xe]  ;;  %v2278_v61 = vcombine.low %v1500_v49, %v3282_v27  ;;  %v1502_v25 = vld [vmem:[#allocation2 + $0x28] sm:$0xe]  ;;  %v2277_v12 = vcombine.low %v1499_v26, %v3287_v29  ;;  %v1496_v28 = vld [vmem:[#allocation2 + $0x30] sm:$0xe] }
 0x11b   : > { %1069 = vrot.lane.b32.xlu1 %v2219_v40, %s2824_s9  ;;  %v2271_v20 = vcombine.low %v1493_v18, %v3276_v21  ;;  %v2280_v16 = vcombine.low %v1502_v25, %v3292_v31  ;;  %v2577_v30 = vld [vmem:[%s3849_s3 + $0x10] sm:$0x3f]   ;;  %v1501_v27 = vld [vmem:[#allocation2 + $0x20] sm:$0xe]  ;;  %v2274_v32 = vcombine.low %v1496_v28, %v3308_v39  ;;  %v1495_v34 = vld [vmem:[#allocation2 + $0x28] sm:$0xe] }
 0x11c   : > { %2407 = vmatprep.subr.msk.bf16.mxu0 %vm1309_vm7, %v2577_v30  ;;  %v3423_v21 = vsel %vm1309_vm7, %v2577_v30, 0  ;;  %v2279_v31 = vcombine.low %v1501_v27, %v3303_v37  ;;  %v1498_v29 = vld [vmem:[#allocation2 + $0x40] sm:$0xe]  ;;  %v2273_v36 = vcombine.low %v1495_v34, %v3317_v43  ;;  %v1504_v40 = vld [vmem:[#allocation2 + $0x38] sm:$0xe] }
 0x11d   : > { %1035 = vrot.lane.b32.xlu0 %v2214_v41, %s2825_s15  ;;  %v2276_v35 = vcombine.low %v1498_v29, %v3322_v46  ;;  %v1497_v41 = vld [vmem:[#allocation2 + $0x38] sm:$0xe]  ;;  %v2282_v39 = vcombine.low %v1504_v40, %v3348_v6  ;;  %v1503_v44 = vld [vmem:[#allocation2 + $0x30] sm:$0xe]  ;;  %v2190_v46 = vcombine.low %v3306_v38, %v3306_v38  ;;  %v1505_v47 = vld [vmem:[#allocation2 + $0x40] sm:$0xe]  ;;  %v2189_v38 = vcombine.low %v3315_v42, %v3315_v42 }
 0x11e   : > { %v2275_v37 = vcombine.low %v1497_v41, %v3338_v10  ;;  %v2281_v43 = vcombine.low %v1503_v44, %v3353_v52  ;;  %v2283_v19 = vcombine.low %v1505_v47, %v3365_v57  ;;  %v2197_v10 = vcombine.low %v3351_v51, %v3351_v51  ;;  %v3471_v6 = vld [vmem:[#allocation2 + $0x4] sm:$0x1]  ;;  %v3473_v52 = vld [vmem:[#allocation2 + $0x8] sm:$0xf]  ;;  %v3475_v51 = vld [vmem:[#allocation2 + $0xc] sm:$0x1] }
 0x11f   : > { %1033 = vrot.lane.b32.xlu1 %v2213_v9, %s2825_s15  ;;  %v2198_v9 = vcombine.low %v3346_v5, %v3346_v5  ;;  %v2199_v42 = vcombine.low %v3363_v56, %v3363_v56  ;;  %v3469_v5 = vld [vmem:[#allocation2] sm:$0xf]  ;;  %v2202_v56 = vcombine.low %v3473_v52, %v3475_v51  ;;  %v3481_v57 = vld [vmem:[#allocation2 + $0x18] sm:$0xf]  ;;  %v3500_v28 = vld [vmem:[#allocation2 + $0x28] sm:$0xf] }
 0x120   : > { %v3502_v30 = vld [vmem:[#allocation2 + $0x2c] sm:$0x1]  ;;  %v3504_v34 = vld [vmem:[#allocation2 + $0x38] sm:$0xf] }
 0x121   : > { %1039 = vrot.lane.b32.xlu0 %v2216_v4, %s2825_s15  ;;  %v2200_v4 = vcombine.low %v3205_v17, %v3205_v17  ;;  %v3465_v17 = vpop.permute.xlu0 %1079 }
 0x123   : > { %1037 = vrot.lane.b32.xlu1 %v2215_v0, %s2825_s15 }
 0x125   : > { %1075 = vrot.lane.b32.xlu0 %v2222_v54, %s2824_s9  ;;  %v3467_v23 = vpop.permute.xlu0 %1609  ;;  %v2201_v54 = vcombine.low %v3469_v5, %v3471_v6 }
 0x127   : > { %1073 = vrot.lane.b32.xlu1 %v2221_v55, %s2824_s9 }
 0x129   : > { %839 = vrot.lane.b32.xlu0 %v2186_v58, %s2825_s15  ;;  %v3483_v58 = vld [vmem:[#allocation2 + $0x1c] sm:$0x1] }
 0x12b   : > { %1077 = vrot.lane.b32.xlu1 %v2223_v59, %s2824_s9 }
 0x12d   : > { %843 = vrot.lane.b32.xlu0 %v2188_v62, %s2825_s15  ;;  %v3486_v62 = vld [vmem:[#allocation2 + $0x10] sm:$0xf] }
 0x12f   : > { %837 = vrot.lane.b32.xlu1 %v2185_v14, %s2825_s15  ;;  %v3488_v14 = vld [vmem:[#allocation2 + $0x14] sm:$0x1] }
 0x130   : > { %v2203_v11 = vcombine.low %v3486_v62, %v3488_v14 }
 0x131   : > { %879 = vrot.lane.b32.xlu0 %v2194_v60, %s2824_s9 }
 0x133   : > { %841 = vrot.lane.b32.xlu1 %v2187_v63, %s2825_s15 }
 0x135   : > { %883 = vrot.lane.b32.xlu0 %v2196_v2, %s2824_s9 }
 0x137   : > { %877 = vrot.lane.b32.xlu1 %v2193_v24, %s2824_s9  ;;  %v2204_v24 = vcombine.low %v3481_v57, %v3483_v58 }
 0x139   : > { %1557 = vrot.lane.b32.xlu0 %v2270_v7, %s2825_s15 }
 0x13b   : > { %881 = vrot.lane.b32.xlu1 %v2195_v8, %s2824_s9 }
 0x13d   : > { %1561 = vrot.lane.b32.xlu0 %v2272_v15, %s2825_s15 }
 0x13f   : > { %1555 = vrot.lane.b32.xlu1 %v2269_v22, %s2825_s15 }
 0x141   : > { %1597 = vrot.lane.b32.xlu0 %v2278_v61, %s2824_s9 }
 0x143   : > { %1559 = vrot.lane.b32.xlu1 %v2271_v20, %s2825_s15 }
 0x145   : > { %1601 = vrot.lane.b32.xlu0 %v2280_v16, %s2824_s9 }
 0x147   : > { %1595 = vrot.lane.b32.xlu1 %v2277_v12, %s2824_s9 }
 0x149   : > { %1565 = vrot.lane.b32.xlu0 %v2274_v32, %s2825_s15 }
 0x14b   : > { %1599 = vrot.lane.b32.xlu1 %v2279_v31, %s2824_s9 }
 0x14d   : > { %1569 = vrot.lane.b32.xlu0 %v2276_v35, %s2825_s15 }
 0x14f   : > { %1563 = vrot.lane.b32.xlu1 %v2273_v36, %s2825_s15 }
 0x151   : > { %1605 = vrot.lane.b32.xlu0 %v2282_v39, %s2824_s9  ;;  %v3506_v39 = vld [vmem:[#allocation2 + $0x3c] sm:$0x1] }
 0x153   : > { %1567 = vrot.lane.b32.xlu1 %v2275_v37, %s2825_s15 }
 0x155   : > { %847 = vrot.lane.b32.xlu0 %v2190_v46, %s2825_s15 }
 0x157   : > { %1603 = vrot.lane.b32.xlu1 %v2281_v43, %s2824_s9 }
 0x159   : > { %851 = vrot.lane.b32.xlu0 %v2192_v48, %s2825_s15 }
 0x15b   : > { %1607 = vrot.lane.b32.xlu1 %v2283_v19, %s2824_s9 }
 0x15d   : > { %887 = vrot.lane.b32.xlu0 %v2198_v9, %s2824_s9 }
 0x15f   : > { %845 = vrot.lane.b32.xlu1 %v2189_v38, %s2825_s15 }
 0x161   : > { %891 = vrot.lane.b32.xlu0 %v2200_v4, %s2824_s9 }
 0x163   : > { %849 = vrot.lane.b32.xlu1 %v2191_v45, %s2825_s15 }
 0x167   : > { %885 = vrot.lane.b32.xlu1 %v2197_v10, %s2824_s9  ;;  %v2206_v10 = vcombine.low %v3500_v28, %v3502_v30 }
 0x16b   : > { %889 = vrot.lane.b32.xlu1 %v2199_v42, %s2824_s9  ;;  %v3511_v42 = vld [vmem:[#allocation2 + $0x20] sm:$0xf]  ;;  %s2675_s9 = scalar_lea.vmem %s2674_s29, 1024 }
 0x16c   : > { %p2677_p4 = scmp.lt.s32.totalorder %s2675_s9, %s2669_s19 }
 0x16e   : > { %p2678_p10 = por %p2677_p4, %p2676_p12 }
 0x170   : > { %p2679_p13 = pnand %p2678_p10, %p2672_p9 }
 0x17e   : > { %v1028_v0 = vpop.permute.xlu0 %1027 }
 0x17f   : > { %v1086_v59 = vsel %vm893_vm8, %v2202_v56, %v1028_v0  ;;  %v2208_v0 = vcombine.low %v3504_v34, %v3506_v39 }
 0x181   : > { %v1026_v50 = vpop.permute.xlu1 %1025 }
 0x182   : > { %v1083_v60 = vsel %vm893_vm8, %v2201_v54, %v1026_v50  ;;  %v1484_v54 = vld [vmem:[#allocation2 + $0x8] sm:$0xe] }
 0x183   : > { %v1032_v53 = vpop.permute.xlu0 %1031 }
 0x184   : > { %v1092_v22 = vsel %vm893_vm8, %v2204_v24, %v1032_v53 }
 0x185   : > { %v1030_v55 = vpop.permute.xlu1 %1029 }
 0x186   : > { %v1089_v20 = vsel %vm893_vm8, %v2203_v11, %v1030_v55 }
 0x187   : > { %v1068_v33 = vpop.permute.xlu0 %1067 }
 0x188   : > { %v1108_v63 = vsel %vm918_vm9, %v1086_v59, %v1068_v33  ;;  %v3521_v59 = vld [vmem:[#allocation2 + $0x24] sm:$0x1] }
 0x189   : > { %v1066_v2 = vpop.permute.xlu1 %1065  ;;  %v2227_v3 = vcombine.low %v1108_v63, %v1108_v63  ;;  %v2228_v7 = vcombine.high %v1108_v63, %v1108_v63 }
 0x18a   : > { %v1106_v8 = vsel %vm918_vm9, %v1083_v60, %v1066_v2 }
 0x18b   : > { %v2225_v13 = vcombine.low %v1106_v8, %v1106_v8  ;;  %v2226_v15 = vcombine.high %v1106_v8, %v1106_v8  ;;  %v1179_v49 = vshrl.u32 %v2227_v3, 16  ;;  %v1182_v18 = vshll.u32 %v2227_v3, 16  ;;  %v1072_v61 = vpop.permute.xlu0 %1071 }
 0x18c   : > { %v1112_v16 = vsel %vm918_vm9, %v1092_v22, %v1072_v61  ;;  %v1188_v31 = vshll.u32 %v2228_v7, 16  ;;  %v2205_v22 = vcombine.low %v3511_v42, %v3521_v59 }
 0x18d   : > { %v1165_v25 = vshrl.u32 %v2225_v13, 16  ;;  %v1168_v26 = vshll.u32 %v2225_v13, 16  ;;  %v1070_v12 = vpop.permute.xlu1 %1069  ;;  %v1181_v27 = vrot.slane %v1179_v49, 4  ;;  %v1184_v32 = vrot.slane %v1182_v18, 5 }
 0x18e   : > { %v2231_v29 = vcombine.low %v1112_v16, %v1112_v16  ;;  %v1174_v40 = vshll.u32 %v2226_v15, 16  ;;  %v2232_v41 = vcombine.high %v1112_v16, %v1112_v16  ;;  %v1110_v43 = vsel %vm918_vm9, %v1089_v20, %v1070_v12  ;;  %v3532_v16 = vld [vmem:[#allocation2 + $0x30] sm:$0xf]  ;;  %v3534_v12 = vld [vmem:[#allocation2 + $0x34] sm:$0x1] }
 0x18f   : > { %v1167_v35 = vrot.slane %v1165_v25, 4  ;;  %v1170_v36 = vrot.slane %v1168_v26, 5  ;;  %v1185_v37 = vor.u32 %v1184_v32, %v1181_v27  ;;  %v1036_v47 = vpop.permute.xlu0 %1035  ;;  %v2229_v19 = vcombine.low %v1110_v43, %v1110_v43 }
 0x190   : > { %v1207_v44 = vshrl.u32 %v2231_v29, 16  ;;  %v1210_v46 = vshll.u32 %v2231_v29, 16  ;;  %v2230_v9 = vcombine.high %v1110_v43, %v1110_v43  ;;  %v1190_v50 = vrot.slane %v1188_v31, 5 }
 0x191   : > { %v1171_v48 = vor.u32 %v1170_v36, %v1167_v35  ;;  %v1034_v38 = vpop.permute.xlu1 %1033  ;;  %v1176_v53 = vrot.slane %v1174_v40, 5  ;;  %v1193_v55 = vshrl.u32 %v2229_v19, 16  ;;  %v1196_v56 = vshll.u32 %v2229_v19, 16 }
 0x192   : > { %v1209_v4 = vrot.slane %v1207_v44, 4  ;;  %v1212_v45 = vrot.slane %v1210_v46, 5  ;;  %v1216_v60 = vshll.u32 %v2232_v41, 16  ;;  %v1186_v24 = vrot.slane %v1185_v37, 4 }
 0x193   : > { %v1040_v63 = vpop.permute.xlu0 %1039  ;;  %v1172_v2 = vrot.slane %v1171_v48, 4  ;;  %v1195_v3 = vrot.slane %v1193_v55, 4  ;;  %v1198_v7 = vrot.slane %v1196_v56, 5  ;;  %v1202_v8 = vshll.u32 %v2230_v9, 16 }
 0x194   : > { %v1213_v33 = vor.u32 %v1212_v45, %v1209_v4  ;;  %v1104_v11 = vsel %vm893_vm8, %v2208_v0, %v1040_v63  ;;  %v1191_v25 = vsel %vm3517_vm12, %v1186_v24, %v1190_v50  ;;  %v1218_v26 = vrot.slane %v1216_v60, 5 }
 0x195   : > { %v1038_v13 = vpop.permute.xlu1 %1037  ;;  %v1120_v49 = vsel %vm918_vm9, %v1104_v11, %v3465_v17  ;;  %v1177_v18 = vsel %vm3517_vm12, %v1172_v2, %v1176_v53  ;;  %v1199_v61 = vor.u32 %v1198_v7, %v1195_v3  ;;  %v1204_v29 = vrot.slane %v1202_v8, 5 }
 0x196   : > { %v1214_v15 = vrot.slane %v1213_v33, 4  ;;  %v2239_v20 = vcombine.low %v1120_v49, %v1120_v49  ;;  %v2243_v27 = vcombine.low %v1177_v18, %v1191_v25  ;;  %v1098_v17 = vsel %vm893_vm8, %v2206_v10, %v1036_v47 }
 0x197   : > { %v1076_v32 = vpop.permute.xlu0 %1075  ;;  %v1200_v31 = vrot.slane %v1199_v61, 4  ;;  %v1095_v35 = vsel %vm893_vm8, %v2205_v22, %v1034_v38  ;;  %v2207_v47 = vcombine.low %v3532_v16, %v3534_v12  ;;  %v2240_v45 = vcombine.high %v1120_v49, %v1120_v49 }
 0x198   : > { %v1219_v40 = vsel %vm3517_vm12, %v1214_v15, %v1218_v26  ;;  %v1263_v41 = vshrl.u32 %v2239_v20, 16  ;;  %2358 = vmatprep.mubr.msk.bf16.mxu1 %vm1296_vm13, %v2243_v27  ;;  %v1116_v37 = vsel %vm918_vm9, %v1098_v17, %v1076_v32  ;;  %v1266_v43 = vshll.u32 %v2239_v20, 16 }
 0x199   : > { %v1074_v36 = vpop.permute.xlu1 %1073  ;;  %v1205_v46 = vsel %vm3517_vm12, %v1200_v31, %v1204_v29  ;;  %v2235_v48 = vcombine.low %v1116_v37, %v1116_v37  ;;  %v2236_v19 = vcombine.high %v1116_v37, %v1116_v37  ;;  %v1101_v10 = vsel %vm893_vm8, %v2207_v47, %v1038_v13 }
 0x19a   : > { %v1114_v44 = vsel %vm918_vm9, %v1095_v35, %v1074_v36  ;;  %v2244_v0 = vcombine.low %v1205_v46, %v1219_v40  ;;  %v1265_v53 = vrot.slane %v1263_v41, 4  ;;  %v1268_v60 = vrot.slane %v1266_v43, 5 }
 0x19b   : > { %v2233_v9 = vcombine.low %v1114_v44, %v1114_v44  ;;  %v2234_v38 = vcombine.high %v1114_v44, %v1114_v44  ;;  %v840_v4 = vpop.permute.xlu0 %839  ;;  %v1235_v55 = vshrl.u32 %v2235_v48, 16  ;;  %v1238_v56 = vshll.u32 %v2235_v48, 16 }
 0x19c   : > { %v1244_v63 = vshll.u32 %v2236_v19, 16  ;;  %2359 = vmatmul.mubr.msk.bf16.vlgmr.msra.gmra.mrb[0].mxu1 %vm1296_vm13, %v2244_v0  ;;  %v1269_v20 = vor.u32 %v1268_v60, %v1265_v53  ;;  %v1272_v32 = vshll.u32 %v2240_v45, 16 }
 0x19d   : > { %v1078_v50 = vpop.permute.xlu1 %1077  ;;  %v1221_v33 = vshrl.u32 %v2233_v9, 16  ;;  %v1224_v2 = vshll.u32 %v2233_v9, 16  ;;  %v1237_v3 = vrot.slane %v1235_v55, 4  ;;  %v1240_v7 = vrot.slane %v1238_v56, 5  ;;  %2387 = vmatpush3.bf16.msra.mxu1 %v3387_v1 }
 0x19e   : > { %v1118_v24 = vsel %vm918_vm9, %v1101_v10, %v1078_v50  ;;  %v1230_v11 = vshll.u32 %v2234_v38, 16  ;;  %v1246_v29 = vrot.slane %v1244_v63, 5  ;;  %v1270_v46 = vrot.slane %v1269_v20, 4 }
 0x19f   : > { %v1223_v8 = vrot.slane %v1221_v33, 4  ;;  %v844_v15 = vpop.permute.xlu0 %843  ;;  %v1226_v13 = vrot.slane %v1224_v2, 5  ;;  %v2237_v22 = vcombine.low %v1118_v24, %v1118_v24  ;;  %v2238_v49 = vcombine.high %v1118_v24, %v1118_v24 }
 0x1a0   : > { %v1241_v61 = vor.u32 %v1240_v7, %v1237_v3  ;;  %v1232_v17 = vrot.slane %v1230_v11, 5  ;;  %v1274_v48 = vrot.slane %v1272_v32, 5  ;;  %v899_v38 = vsel %vm893_vm8, %v3473_v52, %v840_v4 }
 0x1a1   : > { %v838_v18 = vpop.permute.xlu1 %837  ;;  %v1227_v25 = vor.u32 %v1226_v13, %v1223_v8  ;;  %v1249_v26 = vshrl.u32 %v2237_v22, 16  ;;  %v1252_v27 = vshll.u32 %v2237_v22, 16  ;;  %v1258_v37 = vshll.u32 %v2238_v49, 16 }
 0x1a2   : > { %v1242_v31 = vrot.slane %v1241_v61, 4  ;;  %v896_v0 = vsel %vm893_vm8, %v3469_v5, %v838_v18  ;;  %v1275_v33 = vsel %vm3517_vm12, %v1270_v46, %v1274_v48  ;;  %v905_v63 = vsel %vm893_vm8, %v3481_v57, %v844_v15  ;;  %v1483_v15 = vld [vmem:[#allocation2] sm:$0xe] }
 0x1a3   : > { %v880_v35 = vpop.permute.xlu0 %879  ;;  %v1228_v36 = vrot.slane %v1227_v25, 4  ;;  %v1251_v40 = vrot.slane %v1249_v26, 4  ;;  %v1254_v41 = vrot.slane %v1252_v27, 5  ;;  %v1260_v10 = vrot.slane %v1258_v37, 5 }
 0x1a4   : > { %v1247_v1 = vsel %vm3517_vm12, %v1242_v31, %v1246_v29  ;;  %v922_v53 = vsel %vm918_vm9, %v899_v38, %v880_v35  ;;  %v2262_v57 = vcombine.low %v1484_v54, %v3475_v51  ;;  %v2261_v49 = vcombine.low %v1483_v15, %v3471_v6  ;;  %v1485_v51 = vld [vmem:[#allocation2 + $0x10] sm:$0xe] }
 0x1a5   : > { %v842_v44 = vpop.permute.xlu1 %841  ;;  %v1233_v43 = vsel %vm3517_vm12, %v1228_v36, %v1232_v17  ;;  %v1255_v47 = vor.u32 %v1254_v41, %v1251_v40  ;;  %v2263_v40 = vcombine.low %v1485_v51, %v3488_v14  ;;  %v1488_v14 = vld [vmem:[#allocation2 + $0x28] sm:$0xe] }
 0x1a6   : > { %v2245_v19 = vcombine.low %v1233_v43, %v1247_v1  ;;  %v902_v5 = vsel %vm893_vm8, %v3486_v62, %v842_v44  ;;  %v1486_v62 = vld [vmem:[#allocation2 + $0x18] sm:$0xe] }
 0x1a7   : > { %v884_v9 = vpop.permute.xlu0 %883  ;;  %v1256_v45 = vrot.slane %v1255_v47, 4  ;;  %v2264_v20 = vcombine.low %v1486_v62, %v3483_v58 }
 0x1a8   : > { %2362 = vmatprep.mubr.msk.bf16.mxu1 %vm1296_vm13, %v2245_v19  ;;  %v926_v24 = vsel %vm918_vm9, %v905_v63, %v884_v9 }
 0x1a9   : > { %v878_v50 = vpop.permute.xlu1 %877  ;;  %v1261_v56 = vsel %vm3517_vm12, %v1256_v45, %v1260_v10 }
 0x1aa   : > { %v920_v55 = vsel %vm918_vm9, %v896_v0, %v878_v50  ;;  %v2246_v52 = vcombine.low %v1261_v56, %v1275_v33 }
 0x1ab   : > { %v2252_v60 = vcombine.low %v920_v55, %v922_v53  ;;  %v1558_v4 = vpop.permute.xlu0 %1557  ;;  %v1490_v53 = vld [vmem:[#allocation2 + $0x38] sm:$0xe] }
 0x1ac   : > { %2363 = vmatmul.mubr.msk.bf16.gmra.mrb[4].mxu1 %vm1296_vm13, %v2246_v52  ;;  %v1616_v13 = vsel %vm893_vm8, %v2262_v57, %v1558_v4  ;;  %v2266_v4 = vcombine.low %v1488_v14, %v3502_v30  ;;  %v2268_v63 = vcombine.low %v1490_v53, %v3506_v39 }
 0x1ad   : > { %v882_v2 = vpop.permute.xlu1 %881  ;;  %2368 = vmatprep.mubr.msk.bf16.mxu0 %vm1296_vm13, %v2252_v60 }
 0x1ae   : > { %v924_v3 = vsel %vm918_vm9, %v902_v5, %v882_v2 }
 0x1af   : > { %v2253_v7 = vcombine.low %v924_v3, %v926_v24  ;;  %v1562_v8 = vpop.permute.xlu0 %1561 }
 0x1b0   : > { %v1622_v27 = vsel %vm893_vm8, %v2264_v20, %v1562_v8 }
 0x1b1   : > { %v1556_v11 = vpop.permute.xlu1 %1555  ;;  %2369 = vmatmul.mubr.msk.bf16.vlgmr.msra.gmra.mrb[0].mxu0 %vm1296_vm13, %v2253_v7  ;;  %v1487_v7 = vld [vmem:[#allocation2 + $0x20] sm:$0xe] }
 0x1b2   : > { %2377 = vmatpush3.bf16.msra.mxu0 %v3423_v21  ;;  %v1613_v21 = vsel %vm893_vm8, %v2261_v49, %v1556_v11  ;;  %v2265_v57 = vcombine.low %v1487_v7, %v3521_v59 }
 0x1b3   : > { %v1598_v22 = vpop.permute.xlu0 %1597 }
 0x1b4   : > { %v1638_v18 = vsel %vm918_vm9, %v1616_v13, %v1598_v22  ;;  %v1489_v13 = vld [vmem:[#allocation2 + $0x30] sm:$0xe] }
 0x1b5   : > { %v1560_v61 = vpop.permute.xlu1 %1559  ;;  %v2287_v25 = vcombine.low %v1638_v18, %v1638_v18  ;;  %v2288_v26 = vcombine.high %v1638_v18, %v1638_v18 }
 0x1b6   : > { %v1619_v46 = vsel %vm893_vm8, %v2263_v40, %v1560_v61 }
 0x1b7   : > { %v1602_v32 = vpop.permute.xlu0 %1601  ;;  %v2302_v17 = vrot.slane %v2287_v25, 9  ;;  %v1700_v6 = vrot.slane %v2288_v26, 5  ;;  %v2267_v25 = vcombine.low %v1489_v13, %v3534_v12 }
 0x1b8   : > { %v1642_v31 = vsel %vm918_vm9, %v1622_v27, %v1602_v32 }
 0x1b9   : > { %v1596_v29 = vpop.permute.xlu1 %1595  ;;  %v2291_v35 = vcombine.low %v1642_v31, %v1642_v31  ;;  %v2292_v41 = vcombine.high %v1642_v31, %v1642_v31  ;;  %v1701_v19 = vsel %vm3585_vm0, %v2302_v17, %v1700_v6 }
 0x1ba   : > { %v1636_v36 = vsel %vm918_vm9, %v1613_v21, %v1596_v29 }
 0x1bb   : > { %v2285_v37 = vcombine.low %v1636_v36, %v1636_v36  ;;  %v2286_v44 = vcombine.high %v1636_v36, %v1636_v36  ;;  %v1566_v1 = vpop.permute.xlu0 %1565  ;;  %v2304_v9 = vrot.slane %v2291_v35, 9  ;;  %v1708_v45 = vrot.slane %v2292_v41, 5 }
 0x1bc   : > { %v1628_v24 = vsel %vm893_vm8, %v2266_v4, %v1566_v1 }
 0x1bd   : > { %v2301_v43 = vrot.slane %v2285_v37, 9  ;;  %v1696_v47 = vrot.slane %v2286_v44, 5  ;;  %v1600_v48 = vpop.permute.xlu1 %1599  ;;  %v1709_v5 = vsel %vm3585_vm0, %v2304_v9, %v1708_v45 }
 0x1be   : > { %v1640_v38 = vsel %vm918_vm9, %v1619_v46, %v1600_v48 }
 0x1bf   : > { %v1697_v10 = vsel %vm3585_vm0, %v2301_v43, %v1696_v47  ;;  %v2289_v0 = vcombine.low %v1640_v38, %v1640_v38  ;;  %v2290_v50 = vcombine.high %v1640_v38, %v1640_v38  ;;  %v1570_v55 = vpop.permute.xlu0 %1569 }
 0x1c0   : > { %v2311_v56 = vcombine.low %v1697_v10, %v1701_v19  ;;  %v1634_v54 = vsel %vm893_vm8, %v2268_v63, %v1570_v55 }
 0x1c1   : > { %v2303_v33 = vrot.slane %v2289_v0, 9  ;;  %v1704_v60 = vrot.slane %v2290_v50, 5  ;;  %v1564_v52 = vpop.permute.xlu1 %1563  ;;  %v1650_v39 = vsel %vm918_vm9, %v1634_v54, %v3467_v23 }
 0x1c2   : > { %2378 = vmatprep.mubr.msk.bf16.mxu0 %vm1296_vm13, %v2311_v56  ;;  %v1625_v22 = vsel %vm893_vm8, %v2265_v57, %v1564_v52  ;;  %v2299_v61 = vcombine.low %v1650_v39, %v1650_v39  ;;  %v2300_v20 = vcombine.high %v1650_v39, %v1650_v39 }
 0x1c3   : > { %v1705_v2 = vsel %vm3585_vm0, %v2303_v33, %v1704_v60  ;;  %v1606_v8 = vpop.permute.xlu0 %1605 }
 0x1c4   : > { %v2312_v3 = vcombine.low %v1705_v2, %v1709_v5  ;;  %v1646_v11 = vsel %vm918_vm9, %v1628_v24, %v1606_v8  ;;  %v2308_v17 = vrot.slane %v2299_v61, 9  ;;  %v1724_v6 = vrot.slane %v2300_v20, 5 }
 0x1c5   : > { %v1568_v30 = vpop.permute.xlu1 %1567  ;;  %v2295_v15 = vcombine.low %v1646_v11, %v1646_v11  ;;  %v2296_v62 = vcombine.high %v1646_v11, %v1646_v11 }
 0x1c6   : > { %2379 = vmatmul.mubr.msk.bf16.vlgmr.msra.gmra.mrb[0].mxu0 %vm1296_vm13, %v2312_v3  ;;  %v1631_v23 = vsel %vm893_vm8, %v2267_v25, %v1568_v30  ;;  %v1725_v48 = vsel %vm3585_vm0, %v2308_v17, %v1724_v6 }
 0x1c7   : > { %v848_v49 = vpop.permute.xlu0 %847  ;;  %v2306_v27 = vrot.slane %v2295_v15, 9  ;;  %v1716_v51 = vrot.slane %v2296_v62, 5 }
 0x1c8   : > { %v911_v45 = vsel %vm893_vm8, %v3500_v28, %v848_v49 }
 0x1c9   : > { %v1604_v18 = vpop.permute.xlu1 %1603  ;;  %v1717_v36 = vsel %vm3585_vm0, %v2306_v27, %v1716_v51 }
 0x1ca   : > { %v1644_v26 = vsel %vm918_vm9, %v1625_v22, %v1604_v18 }
 0x1cb   : > { %v2293_v32 = vcombine.low %v1644_v26, %v1644_v26  ;;  %v2294_v21 = vcombine.high %v1644_v26, %v1644_v26  ;;  %v852_v40 = vpop.permute.xlu0 %851 }
 0x1cc   : > { %v917_v55 = vsel %vm893_vm8, %v3504_v34, %v852_v40 }
 0x1cd   : > { %v2305_v59 = vrot.slane %v2293_v32, 9  ;;  %v1712_v31 = vrot.slane %v2294_v21, 5  ;;  %v1608_v29 = vpop.permute.xlu1 %1607 }
 0x1ce   : > { %v1648_v35 = vsel %vm918_vm9, %v1631_v23, %v1608_v29 }
 0x1cf   : > { %v1713_v12 = vsel %vm3585_vm0, %v2305_v59, %v1712_v31  ;;  %v2297_v41 = vcombine.low %v1648_v35, %v1648_v35  ;;  %v2298_v37 = vcombine.high %v1648_v35, %v1648_v35  ;;  %v888_v9 = vpop.permute.xlu0 %887 }
 0x1d0   : > { %v2313_v44 = vcombine.low %v1713_v12, %v1717_v36  ;;  %v930_v0 = vsel %vm918_vm9, %v911_v45, %v888_v9 }
 0x1d1   : > { %v2307_v1 = vrot.slane %v2297_v41, 9  ;;  %v1720_v46 = vrot.slane %v2298_v37, 5  ;;  %v846_v43 = vpop.permute.xlu1 %845 }
 0x1d2   : > { %2382 = vmatprep.mubr.msk.bf16.mxu0 %vm1296_vm13, %v2313_v44  ;;  %v908_v10 = vsel %vm893_vm8, %v3511_v42, %v846_v43 }
 0x1d3   : > { %v1721_v47 = vsel %vm3585_vm0, %v2307_v1, %v1720_v46  ;;  %v892_v53 = vpop.permute.xlu0 %891 }
 0x1d4   : > { %v2314_v19 = vcombine.low %v1721_v47, %v1725_v48  ;;  %v934_v28 = vsel %vm918_vm9, %v917_v55, %v892_v53 }
 0x1d5   : > { %v850_v38 = vpop.permute.xlu1 %849 }
 0x1d6   : > { %2383 = vmatmul.mubr.msk.bf16.gmra.mrb[4].mxu0 %vm1296_vm13, %v2314_v19  ;;  %v914_v56 = vsel %vm893_vm8, %v3532_v16, %v850_v38 }
 0x1d9   : > { %v886_v14 = vpop.permute.xlu1 %885 }
 0x1da   : > { %v928_v50 = vsel %vm918_vm9, %v908_v10, %v886_v14 }
 0x1db   : > { %v2254_v58 = vcombine.low %v928_v50, %v930_v0 }
 0x1dd   : > { %v890_v33 = vpop.permute.xlu1 %889  ;;  %2372 = vmatprep.mubr.msk.bf16.mxu1 %vm1296_vm13, %v2254_v58 }
 0x1de   : > { %v932_v42 = vsel %vm918_vm9, %v914_v56, %v890_v33 }
 0x1df   : > { %v2255_v60 = vcombine.low %v932_v42, %v934_v28 }
 0x1e1   : > { %2373 = vmatmul.mubr.msk.bf16.vlgmr.msra.gmra.mrb[4].mxu1 %vm1296_vm13, %v2255_v60 }
 0x26f   : > { %v2360_v52 = vpop.f32.mrb[0].mxu1 }
 0x270   : > { %v1347_v4 = vpop.f32.mrb[1].mxu1 }
 0x271   : > { %v2361_v63 = vpop.f32.mrb[2].mxu1 }
 0x272   : > { %v1350_v5 = vpop.f32.mrb[3].mxu1 }
 0x299   : > { %v2380_v2 = vpop.f32.mrb[0].mxu0 }
 0x29a   : > { %v3640_v34 = vadd.f32 %v2380_v2, %v2360_v52  ;;  %v1795_v24 = vpop.f32.mrb[1].mxu0 }
 0x29b   : > { %v3642_v16 = vadd.f32 %v1795_v24, %v1347_v4  ;;  %v2381_v3 = vpop.f32.mrb[2].mxu0 }
 0x29c   : > { %v1899_v54 = vpack.c.bf16 %v3640_v34, %v3640_v34  ;;  %v3646_v7 = vadd.f32 %v2381_v3, %v2361_v63  ;;  %v1798_v8 = vpop.f32.mrb[3].mxu0  ;;  %v1837_v22 = vsel %vm918_vm9, %v3640_v34, 0.0 }
 0x29d   : > { %v1897_v11 = vpack.c.bf16 %v3642_v16, %v3642_v16  ;;  %v3650_v30 = vadd.f32 %v1798_v8, %v1350_v5  ;;  %v1834_v57 = vsel %vm918_vm9, %v3642_v16, 0.0 }
 0x29e   : > { %1908 = vst.msk [vmem:[%s3652_s25 + $0x8] sm:$0xf] %vm1905_vm1, %v1899_v54  ;;  %v1900_v39 = vpack.c.bf16 %v3646_v7, %v3646_v7  ;;  %v1839_v18 = vsel %vm918_vm9, %v3646_v7, 0.0 }
 0x29f   : > { %1906 = vst.msk [vmem:[%s3652_s25] sm:$0xf] %vm1905_vm1, %v1897_v11  ;;  %v1835_v15 = vsel %vm918_vm9, %v3650_v30, 0.0  ;;  %v1898_v62 = vpack.c.bf16 %v3650_v30, %v3650_v30 }
 0x2a0   : > { %1909 = vst.msk [vmem:[%s3652_s25 + $0xc] sm:$0xf] %vm1905_vm1, %v1900_v39  ;;  %v1836_v13 = vadd.f32 %v1835_v15, %v1834_v57 }
 0x2a1   : > { %1907 = vst.msk [vmem:[%s3652_s25 + $0x4] sm:$0xf] %vm1905_vm1, %v1898_v62 }
 0x2a2   : > { %v1838_v49 = vadd.f32 %v1837_v22, %v1836_v13 }
 0x2a4   : > { %v1840_v61 = vadd.f32 %v1839_v18, %v1838_v49 }
 0x2a9   : > { %v2384_v20 = vpop.f32.mrb[4].mxu0 }
 0x2aa   : > { %v1811_v25 = vpop.f32.mrb[5].mxu0 }
 0x2ab   : > { %v2385_v26 = vpop.f32.mrb[6].mxu0 }
 0x2ac   : > { %v1814_v27 = vpop.f32.mrb[7].mxu0 }
 0x2b4   : > { %v2374_v51 = vpop.f32.mrb[4].mxu1 }
 0x2b5   : > { %v3674_v32 = vadd.f32 %v2384_v20, %v2374_v51  ;;  %v1468_v21 = vpop.f32.mrb[5].mxu1 }
 0x2b6   : > { %v3676_v23 = vadd.f32 %v1811_v25, %v1468_v21  ;;  %v2375_v59 = vpop.f32.mrb[6].mxu1 }
 0x2b7   : > { %v1903_v31 = vpack.c.bf16 %v3674_v32, %v3674_v32  ;;  %v3681_v29 = vadd.f32 %v2385_v26, %v2375_v59  ;;  %v1471_v17 = vpop.f32.mrb[7].mxu1  ;;  %v1845_v1 = vsel %vm918_vm9, %v3674_v32, 0.0 }
 0x2b8   : > { %v1841_v6 = vsel %vm918_vm9, %v3676_v23, 0.0  ;;  %v1901_v35 = vpack.c.bf16 %v3676_v23, %v3676_v23  ;;  %v3688_v36 = vadd.f32 %v1814_v27, %v1471_v17 }
 0x2b9   : > { %1912 = vst.msk [vmem:[%s3652_s25 + $0x18] sm:$0xf] %vm1905_vm1, %v1903_v31  ;;  %v1842_v12 = vadd.f32 %v1841_v6, %v1840_v61  ;;  %v1904_v40 = vpack.c.bf16 %v3681_v29, %v3681_v29 }
 0x2ba   : > { %1910 = vst.msk [vmem:[%s3652_s25 + $0x10] sm:$0xf] %vm1905_vm1, %v1901_v35  ;;  %v1843_v41 = vsel %vm918_vm9, %v3688_v36, 0.0  ;;  %v1902_v37 = vpack.c.bf16 %v3688_v36, %v3688_v36 }
 0x2bb   : > { %1913 = vst.msk [vmem:[%s3652_s25 + $0x1c] sm:$0xf] %vm1905_vm1, %v1904_v40  ;;  %v1844_v44 = vadd.f32 %v1843_v41, %v1842_v12 }
 0x2bc   : > { %1911 = vst.msk [vmem:[%s3652_s25 + $0x14] sm:$0xf] %vm1905_vm1, %v1902_v37 }
 0x2bd   : > { %v1846_v46 = vadd.f32 %v1845_v1, %v1844_v44 }
 0x2be   : > { %2682 = shalt.err (!%p2679_p13)
}
 0x2bf   : > { %s2683_s17 = scalar_lea.hbm %s3697_s11, 512  ;;  %s2687_s30 = scalar_lea.hbm %s3850_s4, 1024 }
 0x2c0   : > { %p2684_p7 = scmp.ne.s32.totalorder %s3697_s11, %s2683_s17  ;;  %p2688_p5 = scmp.lt.u32.totalorder %s3697_s11, %s3850_s4 }
 0x2c1   : > { %p2689_p2 = scmp.lt.u32.totalorder %s2687_s30, %s2683_s17  ;;  %p2691_p0 = scmp.lt.u32.totalorder %s2683_s17, %s3697_s11 }
 0x2c2   : > { %p2685_p11 = pnand %p2684_p7, %p3897_p6 }
 0x2c3   : > { %p2690_p1 = por %p2689_p2, %p2688_p5 }
 0x2c4   : > { %p2686_p3 = pneg %p2685_p11 }
 0x2c5   : > { %p2692_p8 = por %p2691_p0, %p2690_p1 }
 0x2c7   : > { %p2693_p9 = pnand %p2692_p8, %p2686_p3 }
 0x2c9   : > { %2696 = shalt.err (!%p2693_p9)
}
 0x2ca   : > { %s2827_s14 = smov 64   ;;  %v1847_v43 = vsel %vm918_vm9, %v3681_v29, 0.0  ;;  %s2323_s25 = sshll.u32 %s2807_s24, 4  ;;  %vm1894_vm2 = vcmask 57344  }
 0x2cb   : > { %2414 = dma.vmem_to_hbm [thread:$0]  (%p3897_p6), %s3705_s13, 512, %s3697_s11, %s1915_s7, %s2827_s14, %s2827_s14, %s2825_s15   ;;  %v1848_v47 = vadd.f32 %v1847_v43, %v1846_v46 }
 0x2cc   : > { %s411_s26 = scalar_lea.vmem [#allocation10], %s3073_s18  ;;  %s3747_s15 = scalar_lea.hbm %s3851_s5, %s2323_s25 }
 0x2cd   : > { %v1849_v48 = vrot.slane %v1848_v47, 4  ;;  %s1955_s23 = sshll.u32 %s411_s26, 4  ;;  %s3754_s13 = scalar_lea.sflag [#allocation11], %s358_s1  ;;  %s3749_s23 = int_to_ptr.vmem [resolvable:$true] %s1955_s23 }
 0x2ce   : > { %s2697_s11 = scalar_lea.vmem %s3749_s23, 16  ;;  %s2828_s7 = smov [#allocation10]  }
 0x2cf   : > { %v1850_v19 = vadd.f32 %v1849_v48, %v1848_v47  ;;  %p2698_p12 = scmp.ne.s32.totalorder %s3749_s23, %s2697_s11  ;;  %s2701_s28 = sshll.u32 %s2828_s7, 4  ;;  %s2702_s28 = int_to_ptr.vmem [resolvable:$false] %s2701_s28 }
 0x2d0   : > { %s2703_s29 = scalar_lea.vmem %s2702_s28, 32  ;;  %p2704_p13 = scmp.lt.s32.totalorder %s3749_s23, %s2702_s28 }
 0x2d1   : > { %v1851_v9 = vrot.slane %v1850_v19, 2  ;;  %p2699_p4 = pnand %p2698_p12, %p3897_p6  ;;  %p2705_p7 = scmp.lt.s32.totalorder %s2703_s29, %s2697_s11 }
 0x2d3   : > { %v1852_v38 = vadd.f32 %v1851_v9, %v1850_v19  ;;  %p2700_p10 = pneg %p2699_p4  ;;  %p2706_p11 = por %p2705_p7, %p2704_p13 }
 0x2d5   : > { %v1853_v45 = vrot.slane %v1852_v38, 1  ;;  %p2707_p3 = pnand %p2706_p11, %p2700_p10 }
 0x2d7   : > { %v1854_v10 = vadd.f32 %v1853_v45, %v1852_v38 }
 0x2d9   : > { %v1856_v14 = vmul.f32 0.015625, %v1854_v10  ;;  %1895 = vst.msk [vmem:[%s411_s26] sm:$0x1] %vm1894_vm2, %v1854_v10 }
 0x2da   : > { %2710 = shalt.err (!%p2707_p3)
}
 0x2db   : > { %s2711_s27 = scalar_lea.hbm %s3747_s15, 16  ;;  %s2715_s17 = scalar_lea.hbm %s3851_s5, 32 }
 0x2dc   : > { %p2712_p5 = scmp.ne.s32.totalorder %s3747_s15, %s2711_s27  ;;  %p2716_p0 = scmp.lt.u32.totalorder %s3747_s15, %s3851_s5 }
 0x2dd   : > { %p2717_p8 = scmp.lt.u32.totalorder %s2715_s17, %s2711_s27  ;;  %p2719_p12 = scmp.lt.u32.totalorder %s2711_s27, %s3747_s15 }
 0x2de   : > { %p2713_p2 = pnand %p2712_p5, %p3897_p6 }
 0x2df   : > { %p2718_p9 = por %p2717_p8, %p2716_p0 }
 0x2e0   : > { %p2714_p1 = pneg %p2713_p2 }
 0x2e1   : > { %p2720_p4 = por %p2719_p12, %p2718_p9 }
 0x2e3   : > { %p2721_p10 = pnand %p2720_p4, %p2714_p1 }
 0x2e5   : > { %2724 = shalt.err (!%p2721_p10)
}
 0x2e6   : > { %2415 = dma.vmem_to_hbm [thread:$0]  (%p3897_p6), %s3749_s23, 16, %s3747_s15, %s3754_s13   ;;  %v1857_v0 = vsub.f32 %v3642_v16, %v1856_v14  ;;  %v1858_v50 = vsub.f32 %v3650_v30, %v1856_v14  ;;  %v1859_v53 = vsub.f32 %v3640_v34, %v1856_v14  ;;  %v1860_v58 = vsub.f32 %v3646_v7, %v1856_v14 }
 0x2e7   : > { %v1861_v55 = vsub.f32 %v3676_v23, %v1856_v14  ;;  %v1862_v56 = vsub.f32 %v3688_v36, %v1856_v14  ;;  %v1863_v33 = vsub.f32 %v3674_v32, %v1856_v14  ;;  %v1864_v28 = vsub.f32 %v3681_v29, %v1856_v14  ;;  %s417_s30 = scalar_lea.vmem [#allocation12], %s3073_s18  ;;  %s3800_s26 = scalar_lea.hbm %s3852_s6, %s2323_s25 }
 0x2e8   : > { %v1865_v42 = vmul.f32 %v1857_v0, %v1857_v0  ;;  %v1866_v60 = vmul.f32 %v1858_v50, %v1858_v50  ;;  %v1867_v52 = vmul.f32 %v1859_v53, %v1859_v53  ;;  %v1868_v4 = vmul.f32 %v1860_v58, %v1860_v58  ;;  %s1969_s16 = sshll.u32 %s417_s30, 4  ;;  %s2829_s8 = smov [#allocation12]   ;;  %s1970_s16 = int_to_ptr.vmem [resolvable:$true] %s1969_s16 }
 0x2e9   : > { %v1869_v34 = vmul.f32 %v1861_v55, %v1861_v55  ;;  %v1870_v3 = vmul.f32 %v1862_v56, %v1862_v56  ;;  %v1871_v8 = vmul.f32 %v1863_v33, %v1863_v33  ;;  %v1872_v39 = vmul.f32 %v1864_v28, %v1864_v28  ;;  %s2725_s23 = scalar_lea.vmem %s1970_s16, 16  ;;  %s2729_s19 = sshll.u32 %s2829_s8, 4  ;;  %s2730_s19 = int_to_ptr.vmem [resolvable:$false] %s2729_s19 }
 0x2ea   : > { %v1873_v63 = vsel %vm918_vm9, %v1865_v42, 0.0  ;;  %v1874_v5 = vsel %vm918_vm9, %v1866_v60, 0.0  ;;  %v1876_v24 = vsel %vm918_vm9, %v1867_v52, 0.0  ;;  %v1878_v54 = vsel %vm918_vm9, %v1868_v4, 0.0  ;;  %p2726_p13 = scmp.ne.s32.totalorder %s1970_s16, %s2725_s23  ;;  %s2731_s18 = scalar_lea.vmem %s2730_s19, 32 }
 0x2eb   : > { %v1875_v2 = vadd.f32 %v1874_v5, %v1873_v63  ;;  %v1880_v11 = vsel %vm918_vm9, %v1869_v34, 0.0  ;;  %v1882_v57 = vsel %vm918_vm9, %v1870_v3, 0.0  ;;  %v1884_v62 = vsel %vm918_vm9, %v1871_v8, 0.0  ;;  %p2732_p3 = scmp.lt.s32.totalorder %s1970_s16, %s2730_s19  ;;  %p2733_p5 = scmp.lt.s32.totalorder %s2731_s18, %s2725_s23 }
 0x2ec   : > { %v1886_v22 = vsel %vm918_vm9, %v1872_v39, 0.0  ;;  %p2727_p7 = pnand %p2726_p13, %p3897_p6 }
 0x2ed   : > { %v1877_v16 = vadd.f32 %v1876_v24, %v1875_v2  ;;  %p2734_p2 = por %p2733_p5, %p2732_p3 }
 0x2ee   : > { %p2728_p11 = pneg %p2727_p7 }
 0x2ef   : > { %v1879_v7 = vadd.f32 %v1878_v54, %v1877_v16 }
 0x2f0   : > { %p2735_p1 = pnand %p2734_p2, %p2728_p11 }
 0x2f1   : > { %v1881_v30 = vadd.f32 %v1880_v11, %v1879_v7 }
 0x2f3   : > { %v1883_v15 = vadd.f32 %v1882_v57, %v1881_v30 }
 0x2f5   : > { %v1885_v13 = vadd.f32 %v1884_v62, %v1883_v15 }
 0x2f7   : > { %v1887_v49 = vadd.f32 %v1886_v22, %v1885_v13 }
 0x2f9   : > { %v1888_v18 = vrot.slane %v1887_v49, 4 }
 0x2fb   : > { %v1889_v61 = vadd.f32 %v1888_v18, %v1887_v49 }
 0x2fd   : > { %v1890_v20 = vrot.slane %v1889_v61, 2 }
 0x2ff   : > { %v1891_v25 = vadd.f32 %v1890_v20, %v1889_v61 }
 0x301   : > { %v1892_v26 = vrot.slane %v1891_v25, 1 }
 0x303   : > { %v1893_v27 = vadd.f32 %v1892_v26, %v1891_v25 }
 0x305   : > { %1896 = vst.msk [vmem:[%s417_s30] sm:$0x1] %vm1894_vm2, %v1893_v27 }
 0x306   : > { %2738 = shalt.err (!%p2735_p1)
}
 0x307   : > { %s2739_s24 = scalar_lea.hbm %s3800_s26, 16  ;;  %s2743_s11 = scalar_lea.hbm %s3852_s6, 32 }
 0x308   : > { %p2740_p0 = scmp.ne.s32.totalorder %s3800_s26, %s2739_s24  ;;  %p2744_p12 = scmp.lt.u32.totalorder %s3800_s26, %s3852_s6 }
 0x309   : > { %p2745_p4 = scmp.lt.u32.totalorder %s2743_s11, %s2739_s24  ;;  %p2747_p13 = scmp.lt.u32.totalorder %s2739_s24, %s3800_s26 }
 0x30a   : > { %p2741_p8 = pnand %p2740_p0, %p3897_p6 }
 0x30b   : > { %p2746_p10 = por %p2745_p4, %p2744_p12 }
 0x30c   : > { %p2742_p9 = pneg %p2741_p8 }
 0x30d   : > { %p2748_p7 = por %p2747_p13, %p2746_p10 }
 0x30f   : > { %p2749_p11 = pnand %p2748_p7, %p2742_p9 }
 0x311   : > { %2752 = shalt.err (!%p2749_p11)
}
 0x312   : > { %2416 = dma.vmem_to_hbm [thread:$0]  (%p3897_p6), %s1970_s16, 16, %s3800_s26, %s3754_s13  }
 0x313 PF: > { %s3898_s29 = sld [smem:[#allocation17_spill]]  ;;  %s3899_s27 = sld [smem:[#allocation23_spill]] }
 0x314   : > { %s3900_s1 = sld [smem:[#allocation20_spill]] }
 0x319   : > { %s1981_s9 = sand.u32 1, %s3898_s29   ;;  %p3901_p3 = scmp.ne.s32.totalorder %s3899_s27, 0 }
 0x31a   : > { %p3902_p5 = scmp.ge.s32.totalorder %s3900_s1, 2  ;;  %s1982_s17 = scalar_lea.sflag [#allocation5], %s1981_s9 }
 0x31c   : > { %p2431_p2 = pnand %p3902_p5, %p3901_p3 }
 0x31e   : > { %2786 = dma.done.wait (!%p2431_p2), %s1982_s17, 512  }
 0x31f   : > { %2788 = vsyncadd (!%p2431_p2), %s1982_s17, 4294966784  ;;  %s3903_s21 = sadd.s32 4294967294, %s3900_s1  }
 0x320   : > { %s1990_s12 = sand.u32 1, %s3903_s21  }
 0x321   : > { %s1991_s30 = scalar_lea.sflag [#allocation11], %s1990_s12 }
 0x322   : > { %2790 = dma.done.wait (!%p2431_p2), %s1991_s30, 32  }
 0x323   : > { %2792 = vsyncadd (!%p2431_p2), %s1991_s30, 4294967264  ;;  %s29_s26 = sadd.s32 1, %s3900_s1   ;;  %s3904_s10 = sld [smem:[#allocation18_spill]] }
 0x324   : > { %p26_p6 = scmp.ge.s32.totalorder %s29_s26, 4   ;;  %s3905_s23 = sld [smem:[#allocation22_spill]] }
 0x325   : > { %s3906_s24 = sld [smem:[#allocation19_spill]]  ;;  %s3907_s25 = sld [smem:[#allocation21_spill]] }
 0x326   : > { %s3908_s21 = smov %s2799_s22  ;;  %28 = sbr.rel (!%p26_p6) target bundleno = 12 (0xc), region = 142 }
 0x329   : > { %s3909_s22 = smov %s3904_s10 }
 0x32d   :  { %2003 = vsyncpa [#allocation4], 1 }
 0x32e   :  { %2005 = vsyncpa [#allocation4 + $0x1], 1 }
 0x32f   :  { %2006 = vsyncpa [#allocation7], 1 }
 0x330   :  { %2008 = vsyncpa [#allocation7 + $0x1], 1 }
 0x331   :  { %2009 = vsyncpa [#allocation5], 1 }
 0x332   :  { %2011 = vsyncpa [#allocation5 + $0x1], 1 }
 0x333   :  { %2012 = vsyncpa [#allocation11], 1 }
 0x334   :  { %2014 = vsyncpa [#allocation11 + $0x1], 1 }

</bundles_post_ra>
